<compile_context>
chip_gen: v7x
topology: tpu7x:2x2x1
jax: 0.10.0
libtpu: 0.0.40
codegen_flags: <defaults>
</compile_context>

<pallas_src>
import jax
import jax.numpy as jnp
from jax import lax
from jax.experimental import pallas as pl
from jax.experimental.pallas import tpu as pltpu


def _layernorm(x, g, b, eps=1e-5):
    mu = jnp.mean(x, axis=-1, keepdims=True)
    var = jnp.mean((x - mu) ** 2, axis=-1, keepdims=True)
    return (x - mu) * lax.rsqrt(var + eps) * g + b


def _gelu(x):
    return 0.5 * x * (1.0 + jnp.tanh(0.7978845608028654 * (x + 0.044715 * x * x * x)))


def _make_kernel(num_heads):
    def kernel(len_ref,                      # SMEM scalar prefetch: [B] int32 lengths
               x_ref, m_ref,                 # (1,S,H) hidden block, (1,1,S) mask block
               wqkv_ref, bqkv_ref, wo_ref, bo_ref,
               g1_ref, be1_ref, w1_ref, b1_ref, w2_ref, b2_ref, g2_ref, be2_ref,
               wc_ref, bc_ref,
               out_ref,                      # (1,1,NLP) logits block (lane-padded)
               h2_ref):                      # VMEM scratch (S,H) f32
        b = pl.program_id(0)
        S, H = x_ref.shape[1], x_ref.shape[2]
        hd = H // num_heads
        scale = 1.0 / (hd ** 0.5)

        x = x_ref[0]                          # [S, H] f32 — this batch row only
        mask = m_ref[0]                       # [1, S]  1.0 = valid key, 0.0 = pad
        neg = (1.0 - mask) * (-1e9)

        xb = x.astype(jnp.bfloat16)

        # --- fused QKV projection: one wide matmul, bf16 in / f32 accumulate ---
        qkv = jnp.dot(xb, wqkv_ref[...], preferred_element_type=jnp.float32) + bqkv_ref[...]
        qb = qkv[:, 0 * H:1 * H].astype(jnp.bfloat16)
        kb = qkv[:, 1 * H:2 * H].astype(jnp.bfloat16)
        vb = qkv[:, 2 * H:3 * H].astype(jnp.bfloat16)

        # --- multi-head self-attention; output projection accumulated per head
        #     (no lane-offset concatenate). Static unroll over the few heads. ---
        attn = jnp.zeros((S, H), jnp.float32)
        for h in range(num_heads):
            sl = slice(h * hd, (h + 1) * hd)
            s = jnp.dot(qb[:, sl], kb[:, sl].T,
                        preferred_element_type=jnp.float32) * scale + neg      # [S,S]
            s = s - jnp.max(s, axis=-1, keepdims=True)
            p = jnp.exp(s)
            p = p * pl.reciprocal(jnp.sum(p, axis=-1, keepdims=True), approx=True)
            o_h = jnp.dot(p.astype(jnp.bfloat16), vb[:, sl],
                          preferred_element_type=jnp.float32)                  # [S,hd]
            attn = attn + jnp.dot(o_h.astype(jnp.bfloat16), wo_ref[sl, :],
                                  preferred_element_type=jnp.float32)          # [S,H]
        attn = attn + bo_ref[...]

        h1 = _layernorm(x + attn, g1_ref[...], be1_ref[...])

        # --- feed-forward ---
        f = jnp.dot(h1.astype(jnp.bfloat16), w1_ref[...],
                    preferred_element_type=jnp.float32) + b1_ref[...]
        f = _gelu(f)
        f = jnp.dot(f.astype(jnp.bfloat16), w2_ref[...],
                    preferred_element_type=jnp.float32) + b2_ref[...]
        h2_ref[...] = _layernorm(h1 + f, g2_ref[...], be2_ref[...])

        # --- torch.gather at position (input_length - 2): dynamic row load via SMEM idx ---
        idx = len_ref[b] - 2
        pooled = h2_ref[pl.ds(idx, 1), :]                                      # [1,H]

        # --- ffnn: Linear(hidden_dim, num_labels) on a 128-lane-padded output ---
        out_ref[0] = jnp.dot(pooled.astype(jnp.bfloat16), wc_ref[...],
                             preferred_element_type=jnp.float32) + bc_ref[...]

    return kernel


_WEIGHT_NAMES = ["Wqkv", "bqkv", "Wo", "bo", "ln1_g", "ln1_b",
                 "W1", "b1", "W2", "b2", "ln2_g", "ln2_b", "Wc", "bc"]


def _encoder_classifier(x, mask, lengths, kparams, num_heads):
    B, S, H = x.shape
    NLP = kparams["Wc"].shape[1]           # lane-padded label dim (multiple of 128)
    F = kparams["W1"].shape[1]
    weights = [kparams[n] for n in _WEIGHT_NAMES]

    def full_spec(a):
        nd = a.ndim
        # whole-array block, constant index map -> stays resident in VMEM
        return pl.BlockSpec(a.shape, lambda *_, _nd=nd: (0,) * _nd)

    grid_spec = pltpu.PrefetchScalarGridSpec(
        num_scalar_prefetch=1,             # `lengths` lands in SMEM
        grid=(B,),
        in_specs=[pl.BlockSpec((1, S, H), lambda b, lens: (b, 0, 0)),
                  pl.BlockSpec((1, 1, S), lambda b, lens: (b, 0, 0))]
                 + [full_spec(w) for w in weights],
        out_specs=pl.BlockSpec((1, 1, NLP), lambda b, lens: (b, 0, 0)),
        scratch_shapes=[pltpu.VMEM((S, H), jnp.float32)],
    )

    flops_b = (2 * S * H * 3 * H          # fused qkv
               + 4 * S * S * H            # scores + p@v over all heads
               + 2 * S * H * H            # output projection
               + 4 * S * H * F            # ffn
               + 2 * H * NLP)             # classifier
    trans_b = num_heads * S * S + S * F
    w_bytes = sum(int(w.size) * w.dtype.itemsize for w in weights)
    cost = pl.CostEstimate(
        flops=int(B * flops_b),
        transcendentals=int(B * trans_b),
        bytes_accessed=int(B * (S * H * 4 + S * 4 + NLP * 4) + w_bytes),
    )

    out = pl.pallas_call(
        _make_kernel(num_heads),
        grid_spec=grid_spec,
        out_shape=jax.ShapeDtypeStruct((B, 1, NLP), jnp.float32),
        compiler_params=pltpu.CompilerParams(dimension_semantics=("parallel",)),
        cost_estimate=cost,
    )(lengths, x, mask.reshape(B, 1, S), *weights)
    return out.reshape(B, NLP)


def bart_classifier_forward(params, input_ids, attention_mask, input_length, num_heads):
    """Mirrors BartClassifier.forward: slice off BOS, run backbone, gather at len-2, linear."""
    ids = input_ids[:, 1:]
    mask = attention_mask[:, 1:].astype(jnp.float32)
    B, S = ids.shape
    NL = params["Wc"].shape[1]
    NLP = ((NL + 127) // 128) * 128

    # glue: token + positional embedding lookup and embedding layernorm (plain JAX)
    x = params["tok_emb"][ids] + params["pos_emb"][None, :S, :]
    x = _layernorm(x, params["emb_ln_g"], params["emb_ln_b"])

    bf16 = jnp.bfloat16
    kparams = {
        "Wqkv": jnp.concatenate([params["Wq"], params["Wk"], params["Wv"]], axis=1).astype(bf16),
        "bqkv": jnp.concatenate([params["bq"], params["bk"], params["bv"]], axis=1),
        "Wo": params["Wo"].astype(bf16), "bo": params["bo"],
        "ln1_g": params["ln1_g"], "ln1_b": params["ln1_b"],
        "W1": params["W1"].astype(bf16), "b1": params["b1"],
        "W2": params["W2"].astype(bf16), "b2": params["b2"],
        "ln2_g": params["ln2_g"], "ln2_b": params["ln2_b"],
        "Wc": jnp.pad(params["Wc"], ((0, 0), (0, NLP - NL))).astype(bf16),
        "bc": jnp.pad(params["bc"], ((0, 0), (0, NLP - NL))),
    }
    logits_p = _encoder_classifier(x, mask, input_length.astype(jnp.int32), kparams, num_heads)
    return logits_p[:, :NL]


def reference_forward(params, input_ids, attention_mask, input_length, num_heads):
    """Pure-JAX (f32) reference for correctness checking."""
    ids = input_ids[:, 1:]
    mask = attention_mask[:, 1:].astype(jnp.float32)
    B, S = ids.shape
    H = params["tok_emb"].shape[1]
    hd = H // num_heads
    x = params["tok_emb"][ids] + params["pos_emb"][None, :S, :]
    x = _layernorm(x, params["emb_ln_g"], params["emb_ln_b"])
    q = x @ params["Wq"] + params["bq"]
    k = x @ params["Wk"] + params["bk"]
    v = x @ params["Wv"] + params["bv"]

    def split(t):
        return t.reshape(B, S, num_heads, hd).transpose(0, 2, 1, 3)

    qh, kh, vh = split(q), split(k), split(v)
    s = jnp.einsum("bhqd,bhkd->bhqk", qh, kh) / (hd ** 0.5)
    s = s + (1.0 - mask)[:, None, None, :] * (-1e9)
    p = jax.nn.softmax(s, axis=-1)
    a = jnp.einsum("bhqk,bhkd->bhqd", p, vh).transpose(0, 2, 1, 3).reshape(B, S, H)
    a = a @ params["Wo"] + params["bo"]
    h1 = _layernorm(x + a, params["ln1_g"], params["ln1_b"])
    f = _gelu(h1 @ params["W1"] + params["b1"])
    f = f @ params["W2"] + params["b2"]
    h2 = _layernorm(h1 + f, params["ln2_g"], params["ln2_b"])
    idx = input_length.astype(jnp.int32) - 2
    pooled = h2[jnp.arange(B), idx, :]
    return pooled @ params["Wc"] + params["bc"]


def init_params(key, vocab, max_pos, H, F, NL):
    ks = jax.random.split(key, 12)
    std = 0.02
    n = lambda k, shp: (jax.random.normal(k, shp, jnp.float32) * std)
    return {
        "tok_emb": n(ks[0], (vocab, H)),
        "pos_emb": n(ks[1], (max_pos, H)),
        "emb_ln_g": jnp.ones((H,), jnp.float32),
        "emb_ln_b": jnp.zeros((H,), jnp.float32),
        "Wq": n(ks[2], (H, H)), "bq": jnp.zeros((1, H), jnp.float32),
        "Wk": n(ks[3], (H, H)), "bk": jnp.zeros((1, H), jnp.float32),
        "Wv": n(ks[4], (H, H)), "bv": jnp.zeros((1, H), jnp.float32),
        "Wo": n(ks[5], (H, H)), "bo": jnp.zeros((1, H), jnp.float32),
        "ln1_g": jnp.ones((1, H), jnp.float32), "ln1_b": jnp.zeros((1, H), jnp.float32),
        "W1": n(ks[6], (H, F)), "b1": jnp.zeros((1, F), jnp.float32),
        "W2": n(ks[7], (F, H)), "b2": jnp.zeros((1, H), jnp.float32),
        "ln2_g": jnp.ones((1, H), jnp.float32), "ln2_b": jnp.zeros((1, H), jnp.float32),
        "Wc": n(ks[8], (H, NL)), "bc": jnp.zeros((1, NL), jnp.float32),
    }


if __name__ == "__main__":
    # small shapes consistent with the module's forward
    B, S_ORIG, H, NH, F, NL, VOCAB, MAX_POS = 2, 9, 32, 4, 64, 4, 50, 64

    key = jax.random.PRNGKey(0)
    k_par, k_ids = jax.random.split(key)
    params = init_params(k_par, VOCAB, MAX_POS, H, F, NL)

    input_ids = jax.random.randint(k_ids, (B, S_ORIG), 0, VOCAB, dtype=jnp.int32)
    input_length = jnp.array([S_ORIG, 6], dtype=jnp.int32)            # per-example lengths
    attention_mask = (jnp.arange(S_ORIG)[None, :] < input_length[:, None]).astype(jnp.int32)

    logits = bart_classifier_forward(params, input_ids, attention_mask, input_length, NH)
    logits = jax.block_until_ready(logits)

    ref = reference_forward(params, input_ids, attention_mask, input_length, NH)
    assert logits.shape == (B, NL), logits.shape
    # kernel uses bf16 matmul inputs (f32 accumulation) -> compare with a modest tolerance
    assert jnp.allclose(logits, ref, atol=1e-2, rtol=1e-2), (logits, ref)
    print("KERNEL_OK")
</pallas_src>

<mosaic_0001>
module attributes {stable_mosaic.version = 11 : i64} {
  func.func @kernel(%arg0: i32, %arg1: memref<2xi32, #tpu.memory_space<smem>>, %arg2: memref<1x8x32xf32, #tpu.memory_space<vmem>>, %arg3: memref<1x1x8xf32, #tpu.memory_space<vmem>>, %arg4: memref<32x96xbf16, #tpu.memory_space<vmem>>, %arg5: memref<1x96xf32, #tpu.memory_space<vmem>>, %arg6: memref<32x32xbf16, #tpu.memory_space<vmem>>, %arg7: memref<1x32xf32, #tpu.memory_space<vmem>>, %arg8: memref<1x32xf32, #tpu.memory_space<vmem>>, %arg9: memref<1x32xf32, #tpu.memory_space<vmem>>, %arg10: memref<32x64xbf16, #tpu.memory_space<vmem>>, %arg11: memref<1x64xf32, #tpu.memory_space<vmem>>, %arg12: memref<64x32xbf16, #tpu.memory_space<vmem>>, %arg13: memref<1x32xf32, #tpu.memory_space<vmem>>, %arg14: memref<1x32xf32, #tpu.memory_space<vmem>>, %arg15: memref<1x32xf32, #tpu.memory_space<vmem>>, %arg16: memref<32x128xbf16, #tpu.memory_space<vmem>>, %arg17: memref<1x128xf32, #tpu.memory_space<vmem>>, %arg18: memref<1x1x128xf32, #tpu.memory_space<vmem>>, %arg19: memref<8x32xf32, #tpu.memory_space<vmem>>) attributes {dimension_semantics = [#tpu.dimension_semantics<parallel>], iteration_bounds = array<i64: 2>, scalar_prefetch = 1 : i64, scratch_operands = 1 : i64, tpu.core_type = #tpu.core_type<tc>, window_params = [{transform_indices = @transform_0, window_bounds = array<i64: 1, 8, 32>}, {transform_indices = @transform_1, window_bounds = array<i64: 1, 1, 8>}, {pipeline_mode = #tpu.pipeline_mode<synchronous>, transform_indices = @transform_2, window_bounds = array<i64: 32, 96>}, {pipeline_mode = #tpu.pipeline_mode<synchronous>, transform_indices = @transform_3, window_bounds = array<i64: 1, 96>}, {pipeline_mode = #tpu.pipeline_mode<synchronous>, transform_indices = @transform_4, window_bounds = array<i64: 32, 32>}, {pipeline_mode = #tpu.pipeline_mode<synchronous>, transform_indices = @transform_5, window_bounds = array<i64: 1, 32>}, {pipeline_mode = #tpu.pipeline_mode<synchronous>, transform_indices = @transform_6, window_bounds = array<i64: 1, 32>}, {pipeline_mode = #tpu.pipeline_mode<synchronous>, transform_indices = @transform_7, window_bounds = array<i64: 1, 32>}, {pipeline_mode = #tpu.pipeline_mode<synchronous>, transform_indices = @transform_8, window_bounds = array<i64: 32, 64>}, {pipeline_mode = #tpu.pipeline_mode<synchronous>, transform_indices = @transform_9, window_bounds = array<i64: 1, 64>}, {pipeline_mode = #tpu.pipeline_mode<synchronous>, transform_indices = @transform_10, window_bounds = array<i64: 64, 32>}, {pipeline_mode = #tpu.pipeline_mode<synchronous>, transform_indices = @transform_11, window_bounds = array<i64: 1, 32>}, {pipeline_mode = #tpu.pipeline_mode<synchronous>, transform_indices = @transform_12, window_bounds = array<i64: 1, 32>}, {pipeline_mode = #tpu.pipeline_mode<synchronous>, transform_indices = @transform_13, window_bounds = array<i64: 1, 32>}, {pipeline_mode = #tpu.pipeline_mode<synchronous>, transform_indices = @transform_14, window_bounds = array<i64: 32, 128>}, {pipeline_mode = #tpu.pipeline_mode<synchronous>, transform_indices = @transform_15, window_bounds = array<i64: 1, 128>}, {transform_indices = @transform_16, window_bounds = array<i64: 1, 1, 128>}]} {
    %c0 = arith.constant 0 : index
    %c0_0 = arith.constant 0 : index
    %c0_1 = arith.constant 0 : index
    %0 = vector.load %arg2[%c0, %c0_0, %c0_1] : memref<1x8x32xf32, #tpu.memory_space<vmem>>, vector<1x8x32xf32>
    %1 = vector.shape_cast %0 : vector<1x8x32xf32> to vector<8x32xf32>
    %c0_2 = arith.constant 0 : index
    %c0_3 = arith.constant 0 : index
    %c0_4 = arith.constant 0 : index
    %2 = vector.load %arg3[%c0_2, %c0_3, %c0_4] : memref<1x1x8xf32, #tpu.memory_space<vmem>>, vector<1x1x8xf32>
    %3 = vector.shape_cast %2 : vector<1x1x8xf32> to vector<1x8xf32>
    %cst = arith.constant 1.000000e+00 : f32
    %4 = vector.broadcast %cst : f32 to vector<1x8xf32>
    %5 = arith.subf %4, %3 : vector<1x8xf32>
    %cst_5 = arith.constant -1.000000e+09 : f32
    %6 = vector.broadcast %cst_5 : f32 to vector<1x8xf32>
    %7 = arith.mulf %5, %6 : vector<1x8xf32>
    %8 = arith.truncf %1 : vector<8x32xf32> to vector<8x32xbf16>
    %c0_6 = arith.constant 0 : index
    %c0_7 = arith.constant 0 : index
    %9 = vector.load %arg4[%c0_6, %c0_7] : memref<32x96xbf16, #tpu.memory_space<vmem>>, vector<32x96xbf16>
    %cst_8 = arith.constant dense<0.000000e+00> : vector<8x96xf32>
    %10 = tpu.matmul %8, %9, %cst_8 {dimension_numbers = #tpu.dot_dimension_numbers<[1], [0], [0], [1], [0, 0, 1, 1], [], []>} : vector<8x32xbf16>, vector<32x96xbf16>, vector<8x96xf32> -> vector<8x96xf32>
    %c0_9 = arith.constant 0 : index
    %c0_10 = arith.constant 0 : index
    %11 = vector.load %arg5[%c0_9, %c0_10] : memref<1x96xf32, #tpu.memory_space<vmem>>, vector<1x96xf32>
    %12 = vector.broadcast %11 : vector<1x96xf32> to vector<8x96xf32>
    %13 = arith.addf %10, %12 : vector<8x96xf32>
    %14 = vector.extract_strided_slice %13 {offsets = [0, 0], sizes = [8, 32], strides = [1, 1]} : vector<8x96xf32> to vector<8x32xf32>
    %15 = arith.truncf %14 : vector<8x32xf32> to vector<8x32xbf16>
    %16 = vector.extract_strided_slice %13 {offsets = [0, 32], sizes = [8, 32], strides = [1, 1]} : vector<8x96xf32> to vector<8x32xf32>
    %17 = arith.truncf %16 : vector<8x32xf32> to vector<8x32xbf16>
    %18 = vector.extract_strided_slice %13 {offsets = [0, 64], sizes = [8, 32], strides = [1, 1]} : vector<8x96xf32> to vector<8x32xf32>
    %19 = arith.truncf %18 : vector<8x32xf32> to vector<8x32xbf16>
    %cst_11 = arith.constant 0.000000e+00 : f32
    %20 = vector.broadcast %cst_11 : f32 to vector<8x32xf32>
    %21 = vector.extract_strided_slice %15 {offsets = [0, 0], sizes = [8, 8], strides = [1, 1]} : vector<8x32xbf16> to vector<8x8xbf16>
    %22 = vector.extract_strided_slice %17 {offsets = [0, 0], sizes = [8, 8], strides = [1, 1]} : vector<8x32xbf16> to vector<8x8xbf16>
    %23 = tpu.transpose %22, [1, 0] : vector<8x8xbf16> -> vector<8x8xbf16>
    %cst_12 = arith.constant dense<0.000000e+00> : vector<8x8xf32>
    %24 = tpu.matmul %21, %23, %cst_12 {dimension_numbers = #tpu.dot_dimension_numbers<[1], [0], [0], [1], [0, 0, 1, 1], [], []>} : vector<8x8xbf16>, vector<8x8xbf16>, vector<8x8xf32> -> vector<8x8xf32>
    %cst_13 = arith.constant 0.353553385 : f32
    %25 = vector.broadcast %cst_13 : f32 to vector<8x8xf32>
    %26 = arith.mulf %24, %25 : vector<8x8xf32>
    %27 = vector.broadcast %7 : vector<1x8xf32> to vector<8x8xf32>
    %28 = arith.addf %26, %27 : vector<8x8xf32>
    %cst_14 = arith.constant dense<0xFF800000> : vector<8xf32>
    %29 = vector.multi_reduction <maximumf>, %28, %cst_14 [1] : vector<8x8xf32> to vector<8xf32>
    %30 = vector.shape_cast %29 : vector<8xf32> to vector<8x1xf32>
    %31 = vector.broadcast %30 : vector<8x1xf32> to vector<8x8xf32>
    %32 = arith.subf %28, %31 : vector<8x8xf32>
    %33 = math.exp %32 : vector<8x8xf32>
    %cst_15 = arith.constant dense<0.000000e+00> : vector<8xf32>
    %34 = vector.multi_reduction <add>, %33, %cst_15 [1] : vector<8x8xf32> to vector<8xf32>
    %35 = vector.shape_cast %34 : vector<8xf32> to vector<8x1xf32>
    %36 = tpu.reciprocal %35 {approx = true} : vector<8x1xf32> -> vector<8x1xf32>
    %37 = vector.broadcast %36 : vector<8x1xf32> to vector<8x8xf32>
    %38 = arith.mulf %33, %37 : vector<8x8xf32>
    %39 = arith.truncf %38 : vector<8x8xf32> to vector<8x8xbf16>
    %40 = vector.extract_strided_slice %19 {offsets = [0, 0], sizes = [8, 8], strides = [1, 1]} : vector<8x32xbf16> to vector<8x8xbf16>
    %cst_16 = arith.constant dense<0.000000e+00> : vector<8x8xf32>
    %41 = tpu.matmul %39, %40, %cst_16 {dimension_numbers = #tpu.dot_dimension_numbers<[1], [0], [0], [1], [0, 0, 1, 1], [], []>} : vector<8x8xbf16>, vector<8x8xbf16>, vector<8x8xf32> -> vector<8x8xf32>
    %42 = arith.truncf %41 : vector<8x8xf32> to vector<8x8xbf16>
    %c0_17 = arith.constant 0 : index
    %c0_18 = arith.constant 0 : index
    %43 = vector.load %arg6[%c0_17, %c0_18] : memref<32x32xbf16, #tpu.memory_space<vmem>>, vector<8x32xbf16>
    %cst_19 = arith.constant dense<0.000000e+00> : vector<8x32xf32>
    %44 = tpu.matmul %42, %43, %cst_19 {dimension_numbers = #tpu.dot_dimension_numbers<[1], [0], [0], [1], [0, 0, 1, 1], [], []>} : vector<8x8xbf16>, vector<8x32xbf16>, vector<8x32xf32> -> vector<8x32xf32>
    %45 = arith.addf %20, %44 : vector<8x32xf32>
    %46 = vector.extract_strided_slice %15 {offsets = [0, 8], sizes = [8, 8], strides = [1, 1]} : vector<8x32xbf16> to vector<8x8xbf16>
    %47 = vector.extract_strided_slice %17 {offsets = [0, 8], sizes = [8, 8], strides = [1, 1]} : vector<8x32xbf16> to vector<8x8xbf16>
    %48 = tpu.transpose %47, [1, 0] : vector<8x8xbf16> -> vector<8x8xbf16>
    %cst_20 = arith.constant dense<0.000000e+00> : vector<8x8xf32>
    %49 = tpu.matmul %46, %48, %cst_20 {dimension_numbers = #tpu.dot_dimension_numbers<[1], [0], [0], [1], [0, 0, 1, 1], [], []>} : vector<8x8xbf16>, vector<8x8xbf16>, vector<8x8xf32> -> vector<8x8xf32>
    %cst_21 = arith.constant 0.353553385 : f32
    %50 = vector.broadcast %cst_21 : f32 to vector<8x8xf32>
    %51 = arith.mulf %49, %50 : vector<8x8xf32>
    %52 = vector.broadcast %7 : vector<1x8xf32> to vector<8x8xf32>
    %53 = arith.addf %51, %52 : vector<8x8xf32>
    %cst_22 = arith.constant dense<0xFF800000> : vector<8xf32>
    %54 = vector.multi_reduction <maximumf>, %53, %cst_22 [1] : vector<8x8xf32> to vector<8xf32>
    %55 = vector.shape_cast %54 : vector<8xf32> to vector<8x1xf32>
    %56 = vector.broadcast %55 : vector<8x1xf32> to vector<8x8xf32>
    %57 = arith.subf %53, %56 : vector<8x8xf32>
    %58 = math.exp %57 : vector<8x8xf32>
    %cst_23 = arith.constant dense<0.000000e+00> : vector<8xf32>
    %59 = vector.multi_reduction <add>, %58, %cst_23 [1] : vector<8x8xf32> to vector<8xf32>
    %60 = vector.shape_cast %59 : vector<8xf32> to vector<8x1xf32>
    %61 = tpu.reciprocal %60 {approx = true} : vector<8x1xf32> -> vector<8x1xf32>
    %62 = vector.broadcast %61 : vector<8x1xf32> to vector<8x8xf32>
    %63 = arith.mulf %58, %62 : vector<8x8xf32>
    %64 = arith.truncf %63 : vector<8x8xf32> to vector<8x8xbf16>
    %65 = vector.extract_strided_slice %19 {offsets = [0, 8], sizes = [8, 8], strides = [1, 1]} : vector<8x32xbf16> to vector<8x8xbf16>
    %cst_24 = arith.constant dense<0.000000e+00> : vector<8x8xf32>
    %66 = tpu.matmul %64, %65, %cst_24 {dimension_numbers = #tpu.dot_dimension_numbers<[1], [0], [0], [1], [0, 0, 1, 1], [], []>} : vector<8x8xbf16>, vector<8x8xbf16>, vector<8x8xf32> -> vector<8x8xf32>
    %67 = arith.truncf %66 : vector<8x8xf32> to vector<8x8xbf16>
    %c8 = arith.constant 8 : index
    %c0_25 = arith.constant 0 : index
    %68 = vector.load %arg6[%c8, %c0_25] : memref<32x32xbf16, #tpu.memory_space<vmem>>, vector<8x32xbf16>
    %cst_26 = arith.constant dense<0.000000e+00> : vector<8x32xf32>
    %69 = tpu.matmul %67, %68, %cst_26 {dimension_numbers = #tpu.dot_dimension_numbers<[1], [0], [0], [1], [0, 0, 1, 1], [], []>} : vector<8x8xbf16>, vector<8x32xbf16>, vector<8x32xf32> -> vector<8x32xf32>
    %70 = arith.addf %45, %69 : vector<8x32xf32>
    %71 = vector.extract_strided_slice %15 {offsets = [0, 16], sizes = [8, 8], strides = [1, 1]} : vector<8x32xbf16> to vector<8x8xbf16>
    %72 = vector.extract_strided_slice %17 {offsets = [0, 16], sizes = [8, 8], strides = [1, 1]} : vector<8x32xbf16> to vector<8x8xbf16>
    %73 = tpu.transpose %72, [1, 0] : vector<8x8xbf16> -> vector<8x8xbf16>
    %cst_27 = arith.constant dense<0.000000e+00> : vector<8x8xf32>
    %74 = tpu.matmul %71, %73, %cst_27 {dimension_numbers = #tpu.dot_dimension_numbers<[1], [0], [0], [1], [0, 0, 1, 1], [], []>} : vector<8x8xbf16>, vector<8x8xbf16>, vector<8x8xf32> -> vector<8x8xf32>
    %cst_28 = arith.constant 0.353553385 : f32
    %75 = vector.broadcast %cst_28 : f32 to vector<8x8xf32>
    %76 = arith.mulf %74, %75 : vector<8x8xf32>
    %77 = vector.broadcast %7 : vector<1x8xf32> to vector<8x8xf32>
    %78 = arith.addf %76, %77 : vector<8x8xf32>
    %cst_29 = arith.constant dense<0xFF800000> : vector<8xf32>
    %79 = vector.multi_reduction <maximumf>, %78, %cst_29 [1] : vector<8x8xf32> to vector<8xf32>
    %80 = vector.shape_cast %79 : vector<8xf32> to vector<8x1xf32>
    %81 = vector.broadcast %80 : vector<8x1xf32> to vector<8x8xf32>
    %82 = arith.subf %78, %81 : vector<8x8xf32>
    %83 = math.exp %82 : vector<8x8xf32>
    %cst_30 = arith.constant dense<0.000000e+00> : vector<8xf32>
    %84 = vector.multi_reduction <add>, %83, %cst_30 [1] : vector<8x8xf32> to vector<8xf32>
    %85 = vector.shape_cast %84 : vector<8xf32> to vector<8x1xf32>
    %86 = tpu.reciprocal %85 {approx = true} : vector<8x1xf32> -> vector<8x1xf32>
    %87 = vector.broadcast %86 : vector<8x1xf32> to vector<8x8xf32>
    %88 = arith.mulf %83, %87 : vector<8x8xf32>
    %89 = arith.truncf %88 : vector<8x8xf32> to vector<8x8xbf16>
    %90 = vector.extract_strided_slice %19 {offsets = [0, 16], sizes = [8, 8], strides = [1, 1]} : vector<8x32xbf16> to vector<8x8xbf16>
    %cst_31 = arith.constant dense<0.000000e+00> : vector<8x8xf32>
    %91 = tpu.matmul %89, %90, %cst_31 {dimension_numbers = #tpu.dot_dimension_numbers<[1], [0], [0], [1], [0, 0, 1, 1], [], []>} : vector<8x8xbf16>, vector<8x8xbf16>, vector<8x8xf32> -> vector<8x8xf32>
    %92 = arith.truncf %91 : vector<8x8xf32> to vector<8x8xbf16>
    %c16 = arith.constant 16 : index
    %c0_32 = arith.constant 0 : index
    %93 = vector.load %arg6[%c16, %c0_32] : memref<32x32xbf16, #tpu.memory_space<vmem>>, vector<8x32xbf16>
    %cst_33 = arith.constant dense<0.000000e+00> : vector<8x32xf32>
    %94 = tpu.matmul %92, %93, %cst_33 {dimension_numbers = #tpu.dot_dimension_numbers<[1], [0], [0], [1], [0, 0, 1, 1], [], []>} : vector<8x8xbf16>, vector<8x32xbf16>, vector<8x32xf32> -> vector<8x32xf32>
    %95 = arith.addf %70, %94 : vector<8x32xf32>
    %96 = vector.extract_strided_slice %15 {offsets = [0, 24], sizes = [8, 8], strides = [1, 1]} : vector<8x32xbf16> to vector<8x8xbf16>
    %97 = vector.extract_strided_slice %17 {offsets = [0, 24], sizes = [8, 8], strides = [1, 1]} : vector<8x32xbf16> to vector<8x8xbf16>
    %98 = tpu.transpose %97, [1, 0] : vector<8x8xbf16> -> vector<8x8xbf16>
    %cst_34 = arith.constant dense<0.000000e+00> : vector<8x8xf32>
    %99 = tpu.matmul %96, %98, %cst_34 {dimension_numbers = #tpu.dot_dimension_numbers<[1], [0], [0], [1], [0, 0, 1, 1], [], []>} : vector<8x8xbf16>, vector<8x8xbf16>, vector<8x8xf32> -> vector<8x8xf32>
    %cst_35 = arith.constant 0.353553385 : f32
    %100 = vector.broadcast %cst_35 : f32 to vector<8x8xf32>
    %101 = arith.mulf %99, %100 : vector<8x8xf32>
    %102 = vector.broadcast %7 : vector<1x8xf32> to vector<8x8xf32>
    %103 = arith.addf %101, %102 : vector<8x8xf32>
    %cst_36 = arith.constant dense<0xFF800000> : vector<8xf32>
    %104 = vector.multi_reduction <maximumf>, %103, %cst_36 [1] : vector<8x8xf32> to vector<8xf32>
    %105 = vector.shape_cast %104 : vector<8xf32> to vector<8x1xf32>
    %106 = vector.broadcast %105 : vector<8x1xf32> to vector<8x8xf32>
    %107 = arith.subf %103, %106 : vector<8x8xf32>
    %108 = math.exp %107 : vector<8x8xf32>
    %cst_37 = arith.constant dense<0.000000e+00> : vector<8xf32>
    %109 = vector.multi_reduction <add>, %108, %cst_37 [1] : vector<8x8xf32> to vector<8xf32>
    %110 = vector.shape_cast %109 : vector<8xf32> to vector<8x1xf32>
    %111 = tpu.reciprocal %110 {approx = true} : vector<8x1xf32> -> vector<8x1xf32>
    %112 = vector.broadcast %111 : vector<8x1xf32> to vector<8x8xf32>
    %113 = arith.mulf %108, %112 : vector<8x8xf32>
    %114 = arith.truncf %113 : vector<8x8xf32> to vector<8x8xbf16>
    %115 = vector.extract_strided_slice %19 {offsets = [0, 24], sizes = [8, 8], strides = [1, 1]} : vector<8x32xbf16> to vector<8x8xbf16>
    %cst_38 = arith.constant dense<0.000000e+00> : vector<8x8xf32>
    %116 = tpu.matmul %114, %115, %cst_38 {dimension_numbers = #tpu.dot_dimension_numbers<[1], [0], [0], [1], [0, 0, 1, 1], [], []>} : vector<8x8xbf16>, vector<8x8xbf16>, vector<8x8xf32> -> vector<8x8xf32>
    %117 = arith.truncf %116 : vector<8x8xf32> to vector<8x8xbf16>
    %c24 = arith.constant 24 : index
    %c0_39 = arith.constant 0 : index
    %118 = vector.load %arg6[%c24, %c0_39] : memref<32x32xbf16, #tpu.memory_space<vmem>>, vector<8x32xbf16>
    %cst_40 = arith.constant dense<0.000000e+00> : vector<8x32xf32>
    %119 = tpu.matmul %117, %118, %cst_40 {dimension_numbers = #tpu.dot_dimension_numbers<[1], [0], [0], [1], [0, 0, 1, 1], [], []>} : vector<8x8xbf16>, vector<8x32xbf16>, vector<8x32xf32> -> vector<8x32xf32>
    %120 = arith.addf %95, %119 : vector<8x32xf32>
    %c0_41 = arith.constant 0 : index
    %c0_42 = arith.constant 0 : index
    %121 = vector.load %arg7[%c0_41, %c0_42] : memref<1x32xf32, #tpu.memory_space<vmem>>, vector<1x32xf32>
    %122 = vector.broadcast %121 : vector<1x32xf32> to vector<8x32xf32>
    %123 = arith.addf %120, %122 : vector<8x32xf32>
    %124 = arith.addf %1, %123 : vector<8x32xf32>
    %c0_43 = arith.constant 0 : index
    %c0_44 = arith.constant 0 : index
    %125 = vector.load %arg8[%c0_43, %c0_44] : memref<1x32xf32, #tpu.memory_space<vmem>>, vector<1x32xf32>
    %c0_45 = arith.constant 0 : index
    %c0_46 = arith.constant 0 : index
    %126 = vector.load %arg9[%c0_45, %c0_46] : memref<1x32xf32, #tpu.memory_space<vmem>>, vector<1x32xf32>
    %cst_47 = arith.constant dense<0.000000e+00> : vector<8xf32>
    %127 = vector.multi_reduction <add>, %124, %cst_47 [1] : vector<8x32xf32> to vector<8xf32>
    %128 = vector.shape_cast %127 : vector<8xf32> to vector<8x1xf32>
    %cst_48 = arith.constant 3.200000e+01 : f32
    %129 = vector.broadcast %cst_48 : f32 to vector<8x1xf32>
    %130 = arith.divf %128, %129 : vector<8x1xf32>
    %131 = vector.broadcast %130 : vector<8x1xf32> to vector<8x32xf32>
    %132 = arith.subf %124, %131 : vector<8x32xf32>
    %133 = arith.mulf %132, %132 : vector<8x32xf32>
    %cst_49 = arith.constant dense<0.000000e+00> : vector<8xf32>
    %134 = vector.multi_reduction <add>, %133, %cst_49 [1] : vector<8x32xf32> to vector<8xf32>
    %135 = vector.shape_cast %134 : vector<8xf32> to vector<8x1xf32>
    %cst_50 = arith.constant 3.200000e+01 : f32
    %136 = vector.broadcast %cst_50 : f32 to vector<8x1xf32>
    %137 = arith.divf %135, %136 : vector<8x1xf32>
    %138 = vector.broadcast %130 : vector<8x1xf32> to vector<8x32xf32>
    %139 = arith.subf %124, %138 : vector<8x32xf32>
    %cst_51 = arith.constant 9.99999974E-6 : f32
    %140 = vector.broadcast %cst_51 : f32 to vector<8x1xf32>
    %141 = arith.addf %137, %140 : vector<8x1xf32>
    %142 = math.rsqrt %141 : vector<8x1xf32>
    %143 = vector.broadcast %142 : vector<8x1xf32> to vector<8x32xf32>
    %144 = arith.mulf %139, %143 : vector<8x32xf32>
    %145 = vector.broadcast %125 : vector<1x32xf32> to vector<8x32xf32>
    %146 = arith.mulf %144, %145 : vector<8x32xf32>
    %147 = vector.broadcast %126 : vector<1x32xf32> to vector<8x32xf32>
    %148 = arith.addf %146, %147 : vector<8x32xf32>
    %149 = arith.truncf %148 : vector<8x32xf32> to vector<8x32xbf16>
    %c0_52 = arith.constant 0 : index
    %c0_53 = arith.constant 0 : index
    %150 = vector.load %arg10[%c0_52, %c0_53] : memref<32x64xbf16, #tpu.memory_space<vmem>>, vector<32x64xbf16>
    %cst_54 = arith.constant dense<0.000000e+00> : vector<8x64xf32>
    %151 = tpu.matmul %149, %150, %cst_54 {dimension_numbers = #tpu.dot_dimension_numbers<[1], [0], [0], [1], [0, 0, 1, 1], [], []>} : vector<8x32xbf16>, vector<32x64xbf16>, vector<8x64xf32> -> vector<8x64xf32>
    %c0_55 = arith.constant 0 : index
    %c0_56 = arith.constant 0 : index
    %152 = vector.load %arg11[%c0_55, %c0_56] : memref<1x64xf32, #tpu.memory_space<vmem>>, vector<1x64xf32>
    %153 = vector.broadcast %152 : vector<1x64xf32> to vector<8x64xf32>
    %154 = arith.addf %151, %153 : vector<8x64xf32>
    %cst_57 = arith.constant 5.000000e-01 : f32
    %155 = vector.broadcast %cst_57 : f32 to vector<8x64xf32>
    %156 = arith.mulf %155, %154 : vector<8x64xf32>
    %cst_58 = arith.constant 4.471500e-02 : f32
    %157 = vector.broadcast %cst_58 : f32 to vector<8x64xf32>
    %158 = arith.mulf %157, %154 : vector<8x64xf32>
    %159 = arith.mulf %158, %154 : vector<8x64xf32>
    %160 = arith.mulf %159, %154 : vector<8x64xf32>
    %161 = arith.addf %154, %160 : vector<8x64xf32>
    %cst_59 = arith.constant 0.797884583 : f32
    %162 = vector.broadcast %cst_59 : f32 to vector<8x64xf32>
    %163 = arith.mulf %162, %161 : vector<8x64xf32>
    %164 = math.tanh %163 : vector<8x64xf32>
    %cst_60 = arith.constant 1.000000e+00 : f32
    %165 = vector.broadcast %cst_60 : f32 to vector<8x64xf32>
    %166 = arith.addf %165, %164 : vector<8x64xf32>
    %167 = arith.mulf %156, %166 : vector<8x64xf32>
    %168 = arith.truncf %167 : vector<8x64xf32> to vector<8x64xbf16>
    %c0_61 = arith.constant 0 : index
    %c0_62 = arith.constant 0 : index
    %169 = vector.load %arg12[%c0_61, %c0_62] : memref<64x32xbf16, #tpu.memory_space<vmem>>, vector<64x32xbf16>
    %cst_63 = arith.constant dense<0.000000e+00> : vector<8x32xf32>
    %170 = tpu.matmul %168, %169, %cst_63 {dimension_numbers = #tpu.dot_dimension_numbers<[1], [0], [0], [1], [0, 0, 1, 1], [], []>} : vector<8x64xbf16>, vector<64x32xbf16>, vector<8x32xf32> -> vector<8x32xf32>
    %c0_64 = arith.constant 0 : index
    %c0_65 = arith.constant 0 : index
    %171 = vector.load %arg13[%c0_64, %c0_65] : memref<1x32xf32, #tpu.memory_space<vmem>>, vector<1x32xf32>
    %172 = vector.broadcast %171 : vector<1x32xf32> to vector<8x32xf32>
    %173 = arith.addf %170, %172 : vector<8x32xf32>
    %174 = arith.addf %148, %173 : vector<8x32xf32>
    %c0_66 = arith.constant 0 : index
    %c0_67 = arith.constant 0 : index
    %175 = vector.load %arg14[%c0_66, %c0_67] : memref<1x32xf32, #tpu.memory_space<vmem>>, vector<1x32xf32>
    %c0_68 = arith.constant 0 : index
    %c0_69 = arith.constant 0 : index
    %176 = vector.load %arg15[%c0_68, %c0_69] : memref<1x32xf32, #tpu.memory_space<vmem>>, vector<1x32xf32>
    %cst_70 = arith.constant dense<0.000000e+00> : vector<8xf32>
    %177 = vector.multi_reduction <add>, %174, %cst_70 [1] : vector<8x32xf32> to vector<8xf32>
    %178 = vector.shape_cast %177 : vector<8xf32> to vector<8x1xf32>
    %cst_71 = arith.constant 3.200000e+01 : f32
    %179 = vector.broadcast %cst_71 : f32 to vector<8x1xf32>
    %180 = arith.divf %178, %179 : vector<8x1xf32>
    %181 = vector.broadcast %180 : vector<8x1xf32> to vector<8x32xf32>
    %182 = arith.subf %174, %181 : vector<8x32xf32>
    %183 = arith.mulf %182, %182 : vector<8x32xf32>
    %cst_72 = arith.constant dense<0.000000e+00> : vector<8xf32>
    %184 = vector.multi_reduction <add>, %183, %cst_72 [1] : vector<8x32xf32> to vector<8xf32>
    %185 = vector.shape_cast %184 : vector<8xf32> to vector<8x1xf32>
    %cst_73 = arith.constant 3.200000e+01 : f32
    %186 = vector.broadcast %cst_73 : f32 to vector<8x1xf32>
    %187 = arith.divf %185, %186 : vector<8x1xf32>
    %188 = vector.broadcast %180 : vector<8x1xf32> to vector<8x32xf32>
    %189 = arith.subf %174, %188 : vector<8x32xf32>
    %cst_74 = arith.constant 9.99999974E-6 : f32
    %190 = vector.broadcast %cst_74 : f32 to vector<8x1xf32>
    %191 = arith.addf %187, %190 : vector<8x1xf32>
    %192 = math.rsqrt %191 : vector<8x1xf32>
    %193 = vector.broadcast %192 : vector<8x1xf32> to vector<8x32xf32>
    %194 = arith.mulf %189, %193 : vector<8x32xf32>
    %195 = vector.broadcast %175 : vector<1x32xf32> to vector<8x32xf32>
    %196 = arith.mulf %194, %195 : vector<8x32xf32>
    %197 = vector.broadcast %176 : vector<1x32xf32> to vector<8x32xf32>
    %198 = arith.addf %196, %197 : vector<8x32xf32>
    %c0_75 = arith.constant 0 : index
    %c0_76 = arith.constant 0 : index
    %199 = vector.load %arg19[%c0_75, %c0_76] : memref<8x32xf32, #tpu.memory_space<vmem>>, vector<8x32xf32>
    tpu.vector_store %arg19[%c0_75, %c0_76], %198 {strides = array<i32>} : memref<8x32xf32, #tpu.memory_space<vmem>>, vector<8x32xf32>,
    %200 = arith.index_cast %arg0 : i32 to index
    %201 = memref.load %arg1[%200] : memref<2xi32, #tpu.memory_space<smem>>
    %c2_i32 = arith.constant 2 : i32
    %202 = arith.subi %201, %c2_i32 : i32
    %203 = arith.index_cast %202 : i32 to index
    %c0_77 = arith.constant 0 : index
    %204 = vector.load %arg19[%203, %c0_77] : memref<8x32xf32, #tpu.memory_space<vmem>>, vector<1x32xf32>
    %205 = arith.truncf %204 : vector<1x32xf32> to vector<1x32xbf16>
    %c0_78 = arith.constant 0 : index
    %c0_79 = arith.constant 0 : index
    %206 = vector.load %arg16[%c0_78, %c0_79] : memref<32x128xbf16, #tpu.memory_space<vmem>>, vector<32x128xbf16>
    %cst_80 = arith.constant dense<0.000000e+00> : vector<1x128xf32>
    %207 = tpu.matmul %205, %206, %cst_80 {dimension_numbers = #tpu.dot_dimension_numbers<[1], [0], [0], [1], [0, 0, 1, 1], [], []>} : vector<1x32xbf16>, vector<32x128xbf16>, vector<1x128xf32> -> vector<1x128xf32>
    %c0_81 = arith.constant 0 : index
    %c0_82 = arith.constant 0 : index
    %208 = vector.load %arg17[%c0_81, %c0_82] : memref<1x128xf32, #tpu.memory_space<vmem>>, vector<1x128xf32>
    %209 = arith.addf %207, %208 : vector<1x128xf32>
    %c0_83 = arith.constant 0 : index
    %c0_84 = arith.constant 0 : index
    %c0_85 = arith.constant 0 : index
    %210 = vector.load %arg18[%c0_83, %c0_84, %c0_85] : memref<1x1x128xf32, #tpu.memory_space<vmem>>, vector<1x1x128xf32>
    %211 = vector.shape_cast %210 : vector<1x1x128xf32> to vector<1x128xf32>
    %212 = vector.shape_cast %209 : vector<1x128xf32> to vector<1x1x128xf32>
    tpu.vector_store %arg18[%c0_83, %c0_84, %c0_85], %212 {strides = array<i32>} : memref<1x1x128xf32, #tpu.memory_space<vmem>>, vector<1x1x128xf32>,
    return
  }
  func.func @transform_0(%arg0: i32, %arg1: memref<2xi32, #tpu.memory_space<smem>>) -> (i32, i32, i32) {
    %c0_i32 = arith.constant 0 : i32
    %c0_i32_0 = arith.constant 0 : i32
    %c0_i32_1 = arith.constant 0 : i32
    return %arg0, %c0_i32, %c0_i32_0 : i32, i32, i32
  }
  func.func @transform_1(%arg0: i32, %arg1: memref<2xi32, #tpu.memory_space<smem>>) -> (i32, i32, i32) {
    %c0_i32 = arith.constant 0 : i32
    %c0_i32_0 = arith.constant 0 : i32
    %c0_i32_1 = arith.constant 0 : i32
    return %arg0, %c0_i32, %c0_i32_0 : i32, i32, i32
  }
  func.func @transform_2(%arg0: i32, %arg1: memref<2xi32, #tpu.memory_space<smem>>) -> (i32, i32) {
    %c0_i32 = arith.constant 0 : i32
    %c0_i32_0 = arith.constant 0 : i32
    %c0_i32_1 = arith.constant 0 : i32
    return %c0_i32, %c0_i32_0 : i32, i32
  }
  func.func @transform_3(%arg0: i32, %arg1: memref<2xi32, #tpu.memory_space<smem>>) -> (i32, i32) {
    %c0_i32 = arith.constant 0 : i32
    %c0_i32_0 = arith.constant 0 : i32
    %c0_i32_1 = arith.constant 0 : i32
    return %c0_i32, %c0_i32_0 : i32, i32
  }
  func.func @transform_4(%arg0: i32, %arg1: memref<2xi32, #tpu.memory_space<smem>>) -> (i32, i32) {
    %c0_i32 = arith.constant 0 : i32
    %c0_i32_0 = arith.constant 0 : i32
    %c0_i32_1 = arith.constant 0 : i32
    return %c0_i32, %c0_i32_0 : i32, i32
  }
  func.func @transform_5(%arg0: i32, %arg1: memref<2xi32, #tpu.memory_space<smem>>) -> (i32, i32) {
    %c0_i32 = arith.constant 0 : i32
    %c0_i32_0 = arith.constant 0 : i32
    %c0_i32_1 = arith.constant 0 : i32
    return %c0_i32, %c0_i32_0 : i32, i32
  }
  func.func @transform_6(%arg0: i32, %arg1: memref<2xi32, #tpu.memory_space<smem>>) -> (i32, i32) {
    %c0_i32 = arith.constant 0 : i32
    %c0_i32_0 = arith.constant 0 : i32
    %c0_i32_1 = arith.constant 0 : i32
    return %c0_i32, %c0_i32_0 : i32, i32
  }
  func.func @transform_7(%arg0: i32, %arg1: memref<2xi32, #tpu.memory_space<smem>>) -> (i32, i32) {
    %c0_i32 = arith.constant 0 : i32
    %c0_i32_0 = arith.constant 0 : i32
    %c0_i32_1 = arith.constant 0 : i32
    return %c0_i32, %c0_i32_0 : i32, i32
  }
  func.func @transform_8(%arg0: i32, %arg1: memref<2xi32, #tpu.memory_space<smem>>) -> (i32, i32) {
    %c0_i32 = arith.constant 0 : i32
    %c0_i32_0 = arith.constant 0 : i32
    %c0_i32_1 = arith.constant 0 : i32
    return %c0_i32, %c0_i32_0 : i32, i32
  }
  func.func @transform_9(%arg0: i32, %arg1: memref<2xi32, #tpu.memory_space<smem>>) -> (i32, i32) {
    %c0_i32 = arith.constant 0 : i32
    %c0_i32_0 = arith.constant 0 : i32
    %c0_i32_1 = arith.constant 0 : i32
    return %c0_i32, %c0_i32_0 : i32, i32
  }
  func.func @transform_10(%arg0: i32, %arg1: memref<2xi32, #tpu.memory_space<smem>>) -> (i32, i32) {
    %c0_i32 = arith.constant 0 : i32
    %c0_i32_0 = arith.constant 0 : i32
    %c0_i32_1 = arith.constant 0 : i32
    return %c0_i32, %c0_i32_0 : i32, i32
  }
  func.func @transform_11(%arg0: i32, %arg1: memref<2xi32, #tpu.memory_space<smem>>) -> (i32, i32) {
    %c0_i32 = arith.constant 0 : i32
    %c0_i32_0 = arith.constant 0 : i32
    %c0_i32_1 = arith.constant 0 : i32
    return %c0_i32, %c0_i32_0 : i32, i32
  }
  func.func @transform_12(%arg0: i32, %arg1: memref<2xi32, #tpu.memory_space<smem>>) -> (i32, i32) {
    %c0_i32 = arith.constant 0 : i32
    %c0_i32_0 = arith.constant 0 : i32
    %c0_i32_1 = arith.constant 0 : i32
    return %c0_i32, %c0_i32_0 : i32, i32
  }
  func.func @transform_13(%arg0: i32, %arg1: memref<2xi32, #tpu.memory_space<smem>>) -> (i32, i32) {
    %c0_i32 = arith.constant 0 : i32
    %c0_i32_0 = arith.constant 0 : i32
    %c0_i32_1 = arith.constant 0 : i32
    return %c0_i32, %c0_i32_0 : i32, i32
  }
  func.func @transform_14(%arg0: i32, %arg1: memref<2xi32, #tpu.memory_space<smem>>) -> (i32, i32) {
    %c0_i32 = arith.constant 0 : i32
    %c0_i32_0 = arith.constant 0 : i32
    %c0_i32_1 = arith.constant 0 : i32
    return %c0_i32, %c0_i32_0 : i32, i32
  }
  func.func @transform_15(%arg0: i32, %arg1: memref<2xi32, #tpu.memory_space<smem>>) -> (i32, i32) {
    %c0_i32 = arith.constant 0 : i32
    %c0_i32_0 = arith.constant 0 : i32
    %c0_i32_1 = arith.constant 0 : i32
    return %c0_i32, %c0_i32_0 : i32, i32
  }
  func.func @transform_16(%arg0: i32, %arg1: memref<2xi32, #tpu.memory_space<smem>>) -> (i32, i32, i32) {
    %c0_i32 = arith.constant 0 : i32
    %c0_i32_0 = arith.constant 0 : i32
    %c0_i32_1 = arith.constant 0 : i32
    return %arg0, %c0_i32, %c0_i32_0 : i32, i32, i32
  }
}

</mosaic_0001>

<bundles_post_ra>
// kernel: tpu_custom_call.1
= control target key start
LH: loop header
LB: loop body
LE: loop exit
PB: predicated region body
PF: predicated region fallthrough
CT: control target
= control target key end

     0   :  { %s3076_s0 = inlined_call_operand.hbm [shape: s32[2], index: 0, kind: input, shape index: {}]   ;;  %s3077_s1 = inlined_call_operand.vmem [shape: f32[2,8,32], index: 1, kind: input, shape index: {}]   ;;  %s3078_s2 = inlined_call_operand.hbm [shape: f32[2,1,8], index: 2, kind: input, shape index: {}]   ;;  %s3079_s3 = inlined_call_operand.vmem [shape: bf16[32,96], index: 3, kind: input, shape index: {}]   ;;  %s3080_s4 = inlined_call_operand.vmem [shape: f32[1,96], index: 4, kind: input, shape index: {}]   ;;  %s3081_s5 = inlined_call_operand.vmem [shape: bf16[32,32], index: 5, kind: input, shape index: {}]   ;;  %s3082_s6 = inlined_call_operand.hbm [shape: f32[1,32], index: 6, kind: input, shape index: {}]   ;;  %s3083_s7 = inlined_call_operand.hbm [shape: f32[1,32], index: 7, kind: input, shape index: {}]   ;;  %s3084_s8 = inlined_call_operand.hbm [shape: f32[1,32], index: 8, kind: input, shape index: {}]   ;;  %s3085_s9 = inlined_call_operand.vmem [shape: bf16[32,64], index: 9, kind: input, shape index: {}]   ;;  %s3086_s10 = inlined_call_operand.hbm [shape: f32[1,64], index: 10, kind: input, shape index: {}]   ;;  %s3087_s11 = inlined_call_operand.vmem [shape: bf16[64,32], index: 11, kind: input, shape index: {}]   ;;  %s3088_s12 = inlined_call_operand.hbm [shape: f32[1,32], index: 12, kind: input, shape index: {}]   ;;  %s3089_s13 = inlined_call_operand.hbm [shape: f32[1,32], index: 13, kind: input, shape index: {}]   ;;  %s3090_s14 = inlined_call_operand.vmem [shape: f32[1,32], index: 14, kind: input, shape index: {}]   ;;  %s3091_s15 = inlined_call_operand.vmem [shape: bf16[32,128], index: 15, kind: input, shape index: {}]   ;;  %s3092_s16 = inlined_call_operand.vmem [shape: f32[1,128], index: 16, kind: input, shape index: {}]   ;;  %s3093_s17 = inlined_call_operand.hbm [shape: f32[2,1,128], index: 17, kind: output, shape index: {}]  }
   0x1   :  { %3102 = sst [smem:[#allocation24_spill]] %s3076_s0 }
   0x2   :  { %3103 = sst [smem:[#allocation25_spill]] %s3077_s1  ;;  %s3113_s26 = sld [smem:[#allocation24_spill]] }
   0x3   :  { %3104 = sst [smem:[#allocation26_spill]] %s3078_s2 }
   0x4   :  { %3105 = sst [smem:[#allocation27_spill]] %s3079_s3 }
   0x5   :  { %3106 = sst [smem:[#allocation28_spill]] %s3082_s6 }
   0x6   :  { %3107 = sst [smem:[#allocation29_spill]] %s3085_s9 }
   0x7   :  { %3108 = sst [smem:[#allocation30_spill]] %s3087_s11 }
   0x8   :  { %3109 = sst [smem:[#allocation31_spill]] %s3090_s14  ;;  %s2154_s11 = scalar_lea.hbm %s3113_s26, 16 }
   0x9   :  { %3110 = sst [smem:[#allocation32_spill]] %s3091_s15  ;;  %p2155_p0 = scmp.ne.s32.totalorder %s3113_s26, %s2154_s11 }
   0xa   :  { %3111 = sst [smem:[#allocation33_spill]] %s3092_s16  ;;  %p2158_p1 = scmp.lt.u32.totalorder %s2154_s11, %s3113_s26 }
   0xb   :  { %3112 = sst [smem:[#allocation34_spill]] %s3093_s17 }
   0xc   :  { %p2160_p2 = pnand %p2158_p1, %p2155_p0 }
   0xe   :  { %2163 = shalt.err (!%p2160_p2)  }
   0xf   :  { %s2444_s30 = smov [#allocation4]  }
  0x10   :  { %23 = dma.hbm_to_smem %s3113_s26, 16, %s2444_s30, [#allocation3] }
  0x11   :  { %2406 = dma.done.wait [#allocation3], 16 }
  0x12   :  { %2407 = vsyncadd [#allocation3], 4294967280 }
  0x13   :  { %25 = sfence }
  0x14   :  { %26 = vsyncpa [#allocation6], 0 }
  0x15   :  { %28 = vsyncpa [#allocation6 + $0x1], 0 }
  0x16   :  { %29 = vsyncpa [#allocation9], 0 }
  0x17   :  { %30 = vsyncpa [#allocation12], 0 }
  0x18   :  { %31 = vsyncpa [#allocation15], 0 }
  0x19   :  { %32 = vsyncpa [#allocation7], 0 }
  0x1a   :  { %34 = vsyncpa [#allocation7 + $0x1], 0  ;;  %s2568_s1 = smov 0   ;;  %s2570_s11 = smov 0  }
  0x1b   :  { %s2572_s20 = smov 0   ;;  %s2574_s21 = smov 0  }
  0x1c LB: > { %s2445_s22 = smov [#allocation8]   ;;  %s2589_s24 = sadd.s32 4294967295, %s2442_s21   ;;  %s2442_s21 = sphi %s2574_s21, %s3146_s21   ;;  %s2438_s20 = sphi %s2572_s20, %s3145_s20   ;;  %s2434_s11 = sphi %s2570_s11, %s3144_s11   ;;  %s2430_s1 = sphi %s2568_s1, %s3143_s1  }
  0x1d   : > { %s439_s23 = sshll.u32 %s2445_s22, 4  ;;  %p1796_p3 = scmp.ge.s32.totalorder %s2442_s21, 1  ;;  %s2594_s23 = int_to_ptr.vmem [resolvable:$true] %s439_s23 }
  0x1e   : > { %p3099_p4 = scmp.eq.s32.totalorder %s2589_s24, 0  ;;  %p417_p5 = scmp.lt.s32.totalorder %s2442_s21, 3 }
  0x1f   : > { %s2446_s26 = smov [#allocation11]   ;;  %s2447_s28 = smov [#allocation14]  }
  0x20   : > { %p2596_p6 = pnand %p1796_p3, %p417_p5  ;;  %s461_s27 = sshll.u32 %s2446_s26, 4  ;;  %s2603_s27 = int_to_ptr.vmem [resolvable:$true] %s461_s27 }
  0x21   : > { %s489_s29 = sshll.u32 %s2447_s28, 4  ;;  %s2448_s30 = smov [#allocation10]   ;;  %s2611_s29 = int_to_ptr.vmem [resolvable:$true] %s489_s29 }
  0x22   : > { %s3114_s25 = scalar_select %p2596_p6, 1, 0 }
  0x23   : > { %p2029_p8 = pneg %p2596_p6  ;;  %s2613_s18 = sshll.u32 %s2448_s30, 4  ;;  %s451_s18 = int_to_ptr.vmem [resolvable:$true] %s2613_s18 }
  0x24   : > { %s3116_s6 = sld [smem:[#allocation28_spill]] }
  0x25   : > { %p2607_p9 = pnand %p2029_p8, %p3099_p4 }
  0x27   : > { %p2623_p11 = pneg %p2607_p9 }
  0x2a   : > { %s2164_s17 = scalar_lea.hbm %s3116_s6, 16 }
  0x2b   : > { %p2165_p10 = scmp.ne.s32.totalorder %s3116_s6, %s2164_s17  ;;  %p2171_p0 = scmp.lt.u32.totalorder %s2164_s17, %s3116_s6 }
  0x2d   : > { %p2167_p12 = pnand %p2623_p11, %p2165_p10 }
  0x2f   : > { %p2168_p13 = pneg %p2167_p12 }
  0x31   : > { %p2173_p1 = pnand %p2171_p0, %p2168_p13 }
  0x33   : > { %2176 = shalt.err (!%p2173_p1)
}
  0x34   : > { %s2177_s16 = scalar_lea.vmem %s2594_s23, 16  ;;  %s2184_s19 = scalar_lea.vmem %s2594_s23, 32 }
  0x35   : > { %p2178_p2 = scmp.ne.s32.totalorder %s2594_s23, %s2177_s16  ;;  %p2185_p8 = scmp.lt.s32.totalorder %s2594_s23, %s2594_s23 }
  0x36   : > { %p2186_p10 = scmp.lt.s32.totalorder %s2184_s19, %s2177_s16 }
  0x37   : > { %p2180_p3 = pnand %p2178_p2, %p2623_p11 }
  0x38   : > { %p2187_p12 = por %p2186_p10, %p2185_p8 }
  0x39   : > { %p2181_p5 = pneg %p2180_p3 }
  0x3b   : > { %p2188_p7 = pnand %p2187_p12, %p2181_p5 }
  0x3d   : > { %2191 = shalt.err (!%p2188_p7)
}
  0x3e   : > { %2032 = dma.hbm_to_vmem [thread:$0]  (!%p2607_p9), %s3116_s6, 16, %s2594_s23, [#allocation9]  }
  0x3f   : > { %s2192_s30 = scalar_lea.hbm %s3084_s8, 16 }
  0x40   : > { %p2193_p13 = scmp.ne.s32.totalorder %s3084_s8, %s2192_s30  ;;  %p2199_p7 = scmp.lt.u32.totalorder %s2192_s30, %s3084_s8 }
  0x42   : > { %p2195_p0 = pnand %p2193_p13, %p2623_p11 }
  0x44   : > { %p2196_p1 = pneg %p2195_p0 }
  0x46   : > { %p2201_p2 = pnand %p2199_p7, %p2196_p1 }
  0x48   : > { %2204 = shalt.err (!%p2201_p2)
}
  0x49   : > { %s2205_s23 = scalar_lea.vmem %s2603_s27, 16  ;;  %s2212_s9 = scalar_lea.vmem %s2603_s27, 32 }
  0x4a   : > { %p2206_p3 = scmp.ne.s32.totalorder %s2603_s27, %s2205_s23  ;;  %p2213_p10 = scmp.lt.s32.totalorder %s2603_s27, %s2603_s27 }
  0x4b   : > { %p2214_p12 = scmp.lt.s32.totalorder %s2212_s9, %s2205_s23 }
  0x4c   : > { %p2208_p5 = pnand %p2206_p3, %p2623_p11 }
  0x4d   : > { %p2215_p13 = por %p2214_p12, %p2213_p10 }
  0x4e   : > { %p2209_p8 = pneg %p2208_p5 }
  0x50   : > { %p2216_p0 = pnand %p2215_p13, %p2209_p8 }
  0x52   : > { %2219 = shalt.err (!%p2216_p0)
}
  0x53   : > { %2038 = dma.hbm_to_vmem [thread:$0]  (!%p2607_p9), %s3084_s8, 16, %s2603_s27, [#allocation12]  }
  0x54   : > { %s2220_s26 = scalar_lea.hbm %s3088_s12, 16 }
  0x55   : > { %p2221_p1 = scmp.ne.s32.totalorder %s3088_s12, %s2220_s26  ;;  %p2227_p3 = scmp.lt.u32.totalorder %s2220_s26, %s3088_s12 }
  0x57   : > { %p2223_p7 = pnand %p2221_p1, %p2623_p11 }
  0x59   : > { %p2224_p2 = pneg %p2223_p7 }
  0x5b   : > { %p2229_p5 = pnand %p2227_p3, %p2224_p2 }
  0x5d   : > { %2232 = shalt.err (!%p2229_p5)
}
  0x5e   : > { %s2233_s27 = scalar_lea.vmem %s2611_s29, 16  ;;  %s2240_s9 = scalar_lea.vmem %s2611_s29, 32 }
  0x5f   : > { %p2234_p8 = scmp.ne.s32.totalorder %s2611_s29, %s2233_s27  ;;  %p2241_p13 = scmp.lt.s32.totalorder %s2611_s29, %s2611_s29 }
  0x60   : > { %p2242_p0 = scmp.lt.s32.totalorder %s2240_s9, %s2233_s27 }
  0x61   : > { %p2236_p10 = pnand %p2234_p8, %p2623_p11 }
  0x62   : > { %p2243_p1 = por %p2242_p0, %p2241_p13 }
  0x63   : > { %p2237_p12 = pneg %p2236_p10 }
  0x65   : > { %p2244_p7 = pnand %p2243_p1, %p2237_p12 }
  0x67   : > { %2247 = shalt.err (!%p2244_p7)
}
  0x68   : > { %2044 = dma.hbm_to_vmem [thread:$0]  (!%p2607_p9), %s3088_s12, 16, %s2611_s29, [#allocation15]  }
  0x69   : > { %s2449_s17 = smov [#allocation13]   ;;  %s2248_s16 = scalar_lea.hbm %s3083_s7, 16 }
  0x6a   : > { %s475_s22 = sshll.u32 %s2449_s17, 4  ;;  %p2249_p2 = scmp.ne.s32.totalorder %s3083_s7, %s2248_s16  ;;  %s476_s22 = int_to_ptr.vmem [resolvable:$true] %s475_s22 }
  0x6b   : > { %p2255_p8 = scmp.lt.u32.totalorder %s2248_s16, %s3083_s7 }
  0x6c   : > { %p2251_p3 = pnand %p2249_p2, %p2623_p11 }
  0x6e   : > { %p2252_p5 = pneg %p2251_p3 }
  0x70   : > { %p2257_p10 = pnand %p2255_p8, %p2252_p5 }
  0x72   : > { %2260 = shalt.err (!%p2257_p10)
}
  0x73   : > { %s2261_s29 = scalar_lea.vmem %s451_s18, 16  ;;  %s2268_s15 = scalar_lea.vmem %s451_s18, 32 }
  0x74   : > { %p2262_p12 = scmp.ne.s32.totalorder %s451_s18, %s2261_s29  ;;  %p2269_p1 = scmp.lt.s32.totalorder %s451_s18, %s451_s18 }
  0x75   : > { %p2270_p7 = scmp.lt.s32.totalorder %s2268_s15, %s2261_s29 }
  0x76   : > { %p2264_p13 = pnand %p2262_p12, %p2623_p11 }
  0x77   : > { %p2271_p4 = por %p2270_p7, %p2269_p1 }
  0x78   : > { %p2265_p0 = pneg %p2264_p13 }
  0x7a   : > { %p2272_p6 = pnand %p2271_p4, %p2265_p0 }
  0x7c   : > { %2275 = shalt.err (!%p2272_p6)
}
  0x7d   : > { %2035 = dma.hbm_to_vmem [thread:$0]  (!%p2607_p9), %s3083_s7, 16, %s451_s18, [#allocation9]  }
  0x7e   : > { %s2276_s16 = scalar_lea.hbm %s3086_s10, 16 }
  0x7f   : > { %p2277_p2 = scmp.ne.s32.totalorder %s3086_s10, %s2276_s16  ;;  %p2283_p6 = scmp.lt.u32.totalorder %s2276_s16, %s3086_s10 }
  0x81   : > { %p2279_p3 = pnand %p2277_p2, %p2623_p11 }
  0x83   : > { %p2280_p4 = pneg %p2279_p3 }
  0x85   : > { %p2285_p5 = pnand %p2283_p6, %p2280_p4 }
  0x87   : > { %2288 = shalt.err (!%p2285_p5)
}
  0x88   : > { %s2289_s29 = scalar_lea.vmem %s476_s22, 16  ;;  %s2296_s18 = scalar_lea.vmem %s476_s22, 32 }
  0x89   : > { %p2290_p8 = scmp.ne.s32.totalorder %s476_s22, %s2289_s29  ;;  %p2297_p13 = scmp.lt.s32.totalorder %s476_s22, %s476_s22 }
  0x8a   : > { %p2298_p0 = scmp.lt.s32.totalorder %s2296_s18, %s2289_s29 }
  0x8b   : > { %p2292_p10 = pnand %p2290_p8, %p2623_p11 }
  0x8c   : > { %p2299_p1 = por %p2298_p0, %p2297_p13 }
  0x8d   : > { %p2293_p12 = pneg %p2292_p10 }
  0x8f   : > { %p2300_p7 = pnand %p2299_p1, %p2293_p12 }
  0x91   : > { %2303 = shalt.err (!%p2300_p7)
}
  0x92   : > { %2041 = dma.hbm_to_vmem [thread:$0]  (!%p2607_p9), %s3086_s10, 16, %s476_s22, [#allocation12]  }
  0x93   : > { %s2450_s17 = smov [#allocation16]   ;;  %s2304_s19 = scalar_lea.hbm %s3089_s13, 16 }
  0x94   : > { %s500_s26 = sshll.u32 %s2450_s17, 4  ;;  %p2305_p2 = scmp.ne.s32.totalorder %s3089_s13, %s2304_s19  ;;  %s501_s26 = int_to_ptr.vmem [resolvable:$true] %s500_s26 }
  0x95   : > { %p2311_p6 = scmp.lt.u32.totalorder %s2304_s19, %s3089_s13 }
  0x96   : > { %p2307_p3 = pnand %p2305_p2, %p2623_p11 }
  0x98   : > { %p2308_p4 = pneg %p2307_p3 }
  0x9a   : > { %p2313_p5 = pnand %p2311_p6, %p2308_p4 }
  0x9c   : > { %2316 = shalt.err (!%p2313_p5)
}
  0x9d   : > { %s2317_s22 = scalar_lea.vmem %s501_s26, 16  ;;  %s2324_s18 = scalar_lea.vmem %s501_s26, 32 }
  0x9e   : > { %p2318_p8 = scmp.ne.s32.totalorder %s501_s26, %s2317_s22  ;;  %p2325_p13 = scmp.lt.s32.totalorder %s501_s26, %s501_s26 }
  0x9f   : > { %p2326_p0 = scmp.lt.s32.totalorder %s2324_s18, %s2317_s22 }
  0xa0   : > { %p2320_p10 = pnand %p2318_p8, %p2623_p11 }
  0xa1   : > { %p2327_p1 = por %p2326_p0, %p2325_p13 }
  0xa2   : > { %p2321_p12 = pneg %p2320_p10 }
  0xa4   : > { %p2328_p7 = pnand %p2327_p1, %p2321_p12 }
  0xa6   : > { %2331 = shalt.err (!%p2328_p7)
}
  0xa7   : > { %2047 = dma.hbm_to_vmem [thread:$0]  (!%p2607_p9), %s3089_s13, 16, %s501_s26, [#allocation15]  }
  0xa8   : > { %s1795_s28 = sadd.s32 4294967294, %s2442_s21   ;;  %s2750_s0 = sadd.s32 1, %s2442_s21  }
  0xa9   : > { %s70_s17 = ssub.s32 %s2442_s21, %s2750_s0  ;;  %s73_s30 = sadd.s32 1, %s2438_s20 }
  0xaa   : > { %p71_p11 = scmp.eq.s32.totalorder %s70_s17, 0  ;;  %p80_p2 = scmp.ne.s32.totalorder %s2438_s20, %s2434_s11 }
  0xab   : > { %p81_p3 = scmp.eq.s32.totalorder %s2442_s21, 0  ;;  %p86_p4 = scmp.ne.s32.totalorder %s2434_s11, %s2430_s1 }
  0xac   : > { %s2761_s16 = scalar_select %p71_p11, %s2438_s20, %s73_s30  }
  0xad   : > { %p2763_p6 = por %p81_p3, %p80_p2  ;;  %p3119_p5 = scmp.eq.s32.totalorder %s2589_s24, 0 }
  0xae   : > { %p404_p8 = scmp.eq.s32.totalorder %s2589_s24, 1  ;;  %p410_p10 = scmp.eq.s32.totalorder %s1795_s28, 1 }
  0xaf   : > { %p2769_p9 = por %p3119_p5, %p86_p4  ;;  %p2062_p12 = scmp.lt.s32.totalorder %s2442_s21, 2 }
  0xb0   : > { %s527_s23 = sand.u32 1, %s2438_s20   ;;  %p2776_p13 = por %p404_p8, %p80_p2 }
  0xb1   : > { %p2780_p0 = por %p410_p10, %p86_p4  ;;  %s1804_s29 = sshll.u32 %s2442_s21, 4 }
  0xb2   : > { %s3121_s27 = scalar_select %p2776_p13, 1, 0 }
  0xb3   : > { %s3122_s9 = scalar_select %p2780_p0, 1, 0 }
  0xb4   : > { %s530_s22 = scalar_lea.vmem [#allocation5], %s527_s23  ;;  %s3123_s2 = sld [smem:[#allocation26_spill]] }
  0xb5   : > { %s537_s18 = sshll.u32 %s530_s22, 4  ;;  %p2794_p1 = pnand %p2062_p12, %p2763_p6  ;;  %s2790_s18 = int_to_ptr.vmem [resolvable:$true] %s537_s18 }
  0xb6   : > { %s528_s30 = scalar_lea.sflag [#allocation6], %s527_s23 }
  0xb7   : > { %p2334_p11 = pneg %p2794_p1 }
  0xba   : > { %s2788_s17 = scalar_lea.hbm %s3123_s2, %s1804_s29  ;;  %s2337_s14 = scalar_lea.hbm %s3123_s2, 32 }
  0xbb   : > { %s2332_s22 = scalar_lea.hbm %s2788_s17, 16  ;;  %p2338_p4 = scmp.lt.u32.totalorder %s2788_s17, %s3123_s2 }
  0xbc   : > { %p2333_p7 = scmp.ne.s32.totalorder %s2788_s17, %s2332_s22  ;;  %p2339_p6 = scmp.lt.u32.totalorder %s2337_s14, %s2332_s22 }
  0xbd   : > { %p2341_p8 = scmp.lt.u32.totalorder %s2332_s22, %s2788_s17 }
  0xbe   : > { %p2335_p2 = pnand %p2334_p11, %p2333_p7  ;;  %p2340_p5 = por %p2339_p6, %p2338_p4 }
  0xc0   : > { %p2336_p3 = pneg %p2335_p2  ;;  %p2342_p10 = por %p2341_p8, %p2340_p5 }
  0xc2   : > { %p2343_p12 = pnand %p2342_p10, %p2336_p3 }
  0xc4   : > { %2346 = shalt.err (!%p2343_p12)
}
  0xc5   : > { %s2347_s23 = scalar_lea.vmem %s2790_s18, 16  ;;  %s2451_s29 = smov [#allocation5]  }
  0xc6   : > { %p2348_p7 = scmp.ne.s32.totalorder %s2790_s18, %s2347_s23  ;;  %s2352_s15 = sshll.u32 %s2451_s29, 4  ;;  %s2353_s15 = int_to_ptr.vmem [resolvable:$false] %s2352_s15 }
  0xc7   : > { %s2354_s6 = scalar_lea.vmem %s2353_s15, 32  ;;  %p2355_p13 = scmp.lt.s32.totalorder %s2790_s18, %s2353_s15 }
  0xc8   : > { %p2350_p2 = pnand %p2348_p7, %p2334_p11  ;;  %p2356_p4 = scmp.lt.s32.totalorder %s2354_s6, %s2347_s23 }
  0xca   : > { %p2351_p0 = pneg %p2350_p2  ;;  %p2357_p6 = por %p2356_p4, %p2355_p13 }
  0xcc   : > { %p2358_p5 = pnand %p2357_p6, %p2351_p0 }
  0xce   : > { %2361 = shalt.err (!%p2358_p5)
}
  0xcf   : > { %2051 = dma.hbm_to_vmem [thread:$0]  (!%p2794_p1), %s2788_s17, 16, %s2790_s18, %s528_s30  }
  0xd0   : > { %p3125_p3 = scmp.ne.s32.totalorder %s3114_s25, 0 }
  0xd1   : > { %s2826_s22 = sand.u32 (!%p3125_p3), 1, %s2434_s11  }
  0xd2   : > { %546 = sbr.rel (%p3125_p3) target bundleno = 4171 (0x104b), region = 84  ;;  %s549_s14 = scalar_lea.sflag (!%p3125_p3), [#allocation6], %s2826_s22 }
  0xd3   : > { %s551_s19 = scalar_lea.vmem (!%p3125_p3), [#allocation5], %s2826_s22 }
  0xd9   : > { %2409 = dma.done.wait (%p2769_p9), %s549_s14, 16  }
  0xda   : > { %2411 = vsyncadd (%p2769_p9), %s549_s14, 4294967280  ;;  %p3126_p13 = scmp.eq.s32.totalorder %s2589_s24, 0 }
  0xdc   : > { %2413 = dma.done.wait (%p3126_p13), [#allocation9], 32   ;;  %p3127_p0 = pmov %p3126_p13 }
  0xde   : > { %2415 = vsyncadd (%p3127_p0), [#allocation9], 4294967264  ;;  %p3128_p1 = pmov %p3127_p0 }
  0xdf   : > { %p3129_p11 = pmov %p3127_p0 }
  0xe0   : > { %2417 = dma.done.wait (%p3128_p1), [#allocation12], 32  }
  0xe1   : > { %2419 = vsyncadd (%p3129_p11), [#allocation12], 4294967264  ;;  %p3130_p8 = pmov %p3127_p0 }
  0xe2   : > { %p3131_p10 = pmov %p3127_p0 }
  0xe3   : > { %2421 = dma.done.wait (%p3130_p8), [#allocation15], 32  }
  0xe4   : > { %2423 = vsyncadd (%p3131_p10), [#allocation15], 4294967264  ;;  %p626_p9 = scmp.lt.s32.totalorder %s2589_s24, 1  ;;  %v2452_v0 = vmov 0.0   ;;  %vm2453_vm0 = vmmov 0   ;;  %s3132_s28 = sld [smem:[#allocation25_spill]]  ;;  %v756_v17 = vlaneseq }
  0xe5   : > { %1893 = vmatprep.subr.bf16.mxu0 %v2452_v0  ;;  %1897 = vmatprep.mubr.msk.bf16.mxu0 %vm2453_vm0, %v2452_v0  ;;  %s3133_s3 = sld [smem:[#allocation27_spill]]  ;;  %vm659_vm1 = vcmask 261120   ;;  %v1813_v5 = vld [vmem:[%s3080_s4] ss:$0 sm:$0xff]  ;;  %s2455_s18 = smov 96   ;;  %vm707_vm2 = vcmask 64512  }
  0xe6   : > { %s627_s25 = scalar_select %p626_p9, %s2589_s24, 1  ;;  %1901 = vmatprep.subr.bf16.mxu1 %v2452_v0  ;;  %1903 = vmatprep.mubr.msk.bf16.mxu1 %vm2453_vm0, %v2452_v0  ;;  %v632_v18 = vld [vmem:[%s551_s19] sm:$0x1]  ;;  %v757_v20 = vshrl.u32 %v756_v17, 7  ;;  %vm779_vm3 = vcmask 1043456   ;;  %vm1508_vm4 = vcmask 523264  }
  0xe7   : > { %s2456_s17 = smov 88   ;;  %v633_v19 = vsub.f32 1.0, %v632_v18  ;;  %s2457_s19 = smov 64   ;;  %v824_v60 = vld [vmem:[%s3081_s5] sm:$0xf] }
  0xe8   : > { %s1812_s26 = sshll.u32 %s627_s25, 3  ;;  %v758_v22 = vsub.s32 0, %v757_v20  ;;  %s2460_s23 = smov 80   ;;  %v989_v61 = vsel %vm779_vm3, %v824_v60, 0  ;;  %v938_v62 = vld [vmem:[%s3081_s5 + $0x4] sm:$0xf] }
  0xe9   : > { %v634_v21 = vmul.f32 -1e+09, %v633_v19  ;;  %v943_v63 = vsel %vm779_vm3, %v938_v62, 0  ;;  %s2461_s25 = smov 72   ;;  %s3134_s6 = sld [smem:[#allocation29_spill]] }
  0xea   : > { %s629_s30 = scalar_lea.vmem %s3132_s28, %s1812_s26  ;;  %s2454_s26 = smov 120  }
  0xeb   : > { %v2122_v1 = vld [vmem:[%s3133_s3] sm:$0xff]   ;;  %v2123_v2 = vld [vmem:[%s3133_s3 + $0x8] sm:$0xff]   ;;  %v2893_v23 = vrot.slane %v634_v21, %v758_v22  ;;  %s2458_s28 = smov 56   ;;  %s1583_s29 = sld [smem:[#allocation4 + %s2589_s24]] }
  0xec   : > { %1894 = vmatpush3.bf16.msra.mxu0 %v2122_v1  ;;  %v2863_v3 = vld [vmem:[%s629_s30] sm:$0xff]  ;;  %s2459_s30 = smov 112   ;;  %s625_s2 = scalar_lea.vmem [#allocation17], %s2826_s22 }
  0xed   : > { %1895 = vmatprep.subr.bf16.mxu0 %v2452_v0  ;;  %v635_v4 = vpack.c.bf16 %v2863_v3, %v2863_v3  ;;  %s3139_s3 = sld [smem:[#allocation34_spill]]  ;;  %p3140_p7 = scmp.ne.s32.totalorder %s3121_s27, 0 }
  0xee   : > { %s2465_s14 = smov [#allocation17]  }
  0xf0   : > { %1896 = vmatpush3.bf16.msra.mxu0 %v2123_v2 }
  0xf1   : > { %1907 = vmatprep.subr.bf16.mxu0 %v2452_v0  ;;  %s1852_s15 = scalar_lea.vmem [#allocation2], %s1583_s29 }
  0xf3   : > { %1898 = vmatmul.mubr.msk.bf16.vlgmr.msra.gmra.mrb[0].mxu0 %vm659_vm1, %v635_v4 }
  0xf4   : > { %1909 = vmatprep.mubr.msk.bf16.mxu0 %vm2453_vm0, %v2452_v0 }
 0x1c6   : > { %v697_v6 = vpop.f32.mrb[0].mxu0 }
 0x1c7   : > { %v698_v7 = vadd.f32 %v1813_v5, %v697_v6  ;;  %v1899_v8 = vpop.f32.mrb[1].mxu0 }
 0x1c8   : > { %v700_v9 = vpop.f32.mrb[2].mxu0 }
 0x1c9   : > { %v2875_v10 = vpack.c.bf16 %v698_v7, %v698_v7  ;;  %v1900_v11 = vpop.f32.mrb[3].mxu0 }
 0x1cb   : > { %825 = vrot.lane.b32.xlu1 %v2875_v10, %s2454_s26  ;;  %705 = vrot.lane.b32.xlu0 %v2875_v10, %s2455_s18  ;;  %s2462_s26 = smov 104   ;;  %s2463_s18 = smov 48  }
 0x1cf   : > { %827 = vrot.lane.b32.xlu0 %v2875_v10, %s2456_s17  ;;  %s3135_s17 = sld [smem:[#allocation30_spill]] }
 0x23d   : > { %v706_v12 = vpop.permute.xlu0 %705  ;;  %v826_v16 = vpop.permute.xlu1 %825 }
 0x23e   : > { %v712_v13 = vsel %vm707_vm2, %v706_v12, 0 }
 0x23f   : > { %1902 = vmatpush3.bf16.xpose.msra.mxu1 %v712_v13 }
 0x240   : > { %1913 = vmatprep.subr.bf16.mxu1 %v2452_v0 }
 0x241   : > { %v828_v14 = vpop.permute.xlu0 %827 }
 0x242   : > { %v833_v15 = vsel %vm707_vm2, %v828_v14, 0 }
 0x246   : > { %1904 = vmatmul.mubr.msk.bf16.vlgmr.msra.gmra.mrb[0].mxu1 %vm707_vm2, %v2875_v10 }
 0x247   : > { %1914 = vmatpush3.bf16.xpose.msra.mxu1 %v833_v15  ;;  %1915 = vmatprep.mubr.msk.bf16.mxu1 %vm2453_vm0, %v2452_v0 }
 0x248   : > { %1925 = vmatprep.subr.bf16.mxu1 %v2452_v0 }
 0x24e   : > { %1916 = vmatmul.mubr.msk.bf16.vlgmr.msra.gmra.mrb[4].mxu1 %vm707_vm2, %v826_v16 }
 0x24f   : > { %1927 = vmatprep.mubr.msk.bf16.mxu1 %vm2453_vm0, %v2452_v0  ;;  %1926 = vmatpush3.bf16.msra.mxu1 %v943_v63 }
 0x250   : > { %1937 = vmatprep.subr.bf16.mxu1 %v2452_v0 }
 0x319   : > { %v748_v24 = vpop.f32.mrb[0].mxu1 }
 0x31a   : > { %v754_v25 = vmul.f32 0.35355338, %v748_v24  ;;  %v1905_v26 = vpop.f32.mrb[1].mxu1 }
 0x31b   : > { %v751_v27 = vpop.f32.mrb[2].mxu1 }
 0x31c   : > { %v1906_v28 = vpop.f32.mrb[3].mxu1  ;;  %v761_v29 = vadd.f32 %v2893_v23, %v754_v25 }
 0x31e   : > { %v762_v30 = vsel %vm707_vm2, %v761_v29, -inf }
 0x31f   : > { %763 = vmax.xlane.f32.xlu1 %v762_v30 }
 0x321   : > { %v869_v31 = vpop.f32.mrb[4].mxu1 }
 0x322   : > { %v875_v32 = vmul.f32 0.35355338, %v869_v31  ;;  %v1917_v33 = vpop.f32.mrb[5].mxu1 }
 0x323   : > { %v872_v34 = vpop.f32.mrb[6].mxu1 }
 0x324   : > { %v1918_v35 = vpop.f32.mrb[7].mxu1  ;;  %v876_v36 = vadd.f32 %v875_v32, %v2893_v23 }
 0x326   : > { %v877_v37 = vsel %vm707_vm2, %v876_v36, -inf }
 0x327   : > { %878 = vmax.xlane.f32.xlu0 %v877_v37 }
 0x3ac   : > { %v764_v38 = vpop.xlane.xlu1 %763 }
 0x3ad   : > { %v765_v39 = vsub.f32 %v761_v29, %v764_v38 }
 0x3af   : > { %v766_v40 = vmul.f32 1.442695, %v765_v39 }
 0x3b1   : > { %2132 = vpow2.f32 %v766_v40 }
 0x3b4   : > { %v879_v41 = vpop.xlane.xlu0 %878 }
 0x3b5   : > { %v880_v42 = vsub.f32 %v876_v36, %v879_v41 }
 0x3b7   : > { %v881_v43 = vmul.f32 1.442695, %v880_v42 }
 0x3b9   : > { %2134 = vpow2.f32 %v881_v43 }
 0x3bb   : > { %v2133_v44 = vpop.eup %2132 }
 0x3bc   : > { %v768_v45 = vsel %vm707_vm2, %v2133_v44, 0.0 }
 0x3bd   : > { %769 = vadd.xlane.f32.xlu0 %v768_v45 }
 0x3c3   : > { %v2135_v46 = vpop.eup %2134 }
 0x3c4   : > { %v883_v47 = vsel %vm707_vm2, %v2135_v46, 0.0 }
 0x3c5   : > { %884 = vadd.xlane.f32.xlu1 %v883_v47  ;;  %v1144_v47 = vld [vmem:[%s3081_s5 + $0x8] sm:$0xf] }
 0x3d3   : > { %774 = vrot.lane.b32.xlu0 %v2875_v10, %s2457_s19  ;;  %s1849_s19 = sshll.u32 %s2589_s24, 4 }
 0x3d4   : > { %s3032_s29 = scalar_lea.hbm %s3139_s3, %s1849_s19 }
 0x3d6   : > { %889 = vrot.lane.b32.xlu1 %v2875_v10, %s2458_s28  ;;  %s2464_s28 = smov 40  }
 0x3d7   : > { %1031 = vrot.lane.b32.xlu0 %v2875_v10, %s2459_s30 }
 0x3da   : > { %1033 = vrot.lane.b32.xlu1 %v2875_v10, %s2460_s23  ;;  %s3137_s23 = sld [smem:[#allocation31_spill]] }
 0x44a   : > { %v770_v48 = vpop.xlane.xlu0 %769 }
 0x44b   : > { %2136 = vrcp.f32 %v770_v48  ;;  %v1149_v48 = vsel %vm779_vm3, %v1144_v47, 0  ;;  %v2126_v47 = vld [vmem:[%s3135_s17] sm:$0xff]  }
 0x44e   : > { %v775_v49 = vpop.permute.xlu0 %774 }
 0x44f   : > { %v781_v50 = vsel %vm779_vm3, %v775_v49, 0 }
 0x450   : > { %1908 = vmatpush3.bf16.msra.mxu0 %v781_v50 }
 0x451   : > { %1919 = vmatprep.subr.bf16.mxu0 %v2452_v0 }
 0x452   : > { %v885_v51 = vpop.xlane.xlu1 %884  ;;  %v1032_v15 = vpop.permute.xlu0 %1031 }
 0x453   : > { %2138 = vrcp.f32 %v885_v51 }
 0x455   : > { %v2137_v52 = vpop.eup %2136 }
 0x456   : > { %v772_v53 = vmul.f32 %v2137_v52, %v2133_v44  ;;  %v890_v54 = vpop.permute.xlu1 %889 }
 0x457   : > { %v895_v56 = vsel %vm779_vm3, %v890_v54, 0 }
 0x458   : > { %v773_v55 = vpack.c.bf16 %v772_v53, %v772_v53 }
 0x45a   : > { %1910 = vmatmul.mubr.msk.bf16.vlgmr.msra.gmra.mrb[4].mxu0 %vm707_vm2, %v773_v55  ;;  %v1034_v7 = vpop.permute.xlu1 %1033 }
 0x45b   : > { %1920 = vmatpush3.bf16.msra.mxu0 %v895_v56  ;;  %1921 = vmatprep.mubr.msk.bf16.mxu0 %vm2453_vm0, %v2452_v0  ;;  %v1039_v13 = vsel %vm707_vm2, %v1034_v7, 0 }
 0x45c   : > { %1931 = vmatprep.subr.bf16.mxu0 %v2452_v0 }
 0x45d   : > { %v2139_v57 = vpop.eup %2138 }
 0x45e   : > { %v887_v58 = vmul.f32 %v2139_v57, %v2135_v46 }
 0x460   : > { %v888_v59 = vpack.c.bf16 %v887_v58, %v887_v58 }
 0x462   : > { %1922 = vmatmul.mubr.msk.bf16.vlgmr.msra.gmra.mrb[8].mxu0 %vm707_vm2, %v888_v59 }
 0x463   : > { %1933 = vmatprep.mubr.msk.bf16.mxu0 %vm2453_vm0, %v2452_v0  ;;  %1932 = vmatpush3.bf16.msra.mxu0 %v989_v61 }
 0x464   : > { %1943 = vmatprep.subr.bf16.mxu0 %v2452_v0 }
 0x52d   : > { %v817_v1 = vpop.f32.mrb[4].mxu0 }
 0x52e   : > { %v823_v2 = vpack.c.bf16 %v817_v1, %v817_v1  ;;  %v1911_v4 = vpop.f32.mrb[5].mxu0 }
 0x52f   : > { %v820_v5 = vpop.f32.mrb[6].mxu0 }
 0x530   : > { %v1912_v6 = vpop.f32.mrb[7].mxu0  ;;  %1934 = vmatmul.mubr.msk.bf16.vlgmr.msra.gmra.mrb[12].mxu0 %vm707_vm2, %v823_v2 }
 0x531   : > { %1945 = vmatprep.mubr.msk.bf16.mxu0 %vm2453_vm0, %v2452_v0 }
 0x535   : > { %v931_v8 = vpop.f32.mrb[8].mxu0 }
 0x536   : > { %v937_v9 = vpack.c.bf16 %v931_v8, %v931_v8  ;;  %v1923_v11 = vpop.f32.mrb[9].mxu0 }
 0x537   : > { %v934_v12 = vpop.f32.mrb[10].mxu0 }
 0x538   : > { %v1924_v14 = vpop.f32.mrb[11].mxu0  ;;  %1928 = vmatmul.mubr.msk.bf16.vlgmr.msra.gmra.mrb[8].mxu1 %vm707_vm2, %v937_v9 }
 0x539   : > { %1938 = vmatpush3.bf16.xpose.msra.mxu1 %v1039_v13  ;;  %1939 = vmatprep.mubr.msk.bf16.mxu1 %vm2453_vm0, %v2452_v0 }
 0x53a   : > { %1949 = vmatprep.subr.bf16.mxu1 %v2452_v0 }
 0x540   : > { %1940 = vmatmul.mubr.msk.bf16.vlgmr.msra.gmra.mrb[12].mxu1 %vm707_vm2, %v1032_v15 }
 0x541   : > { %1951 = vmatprep.mubr.msk.bf16.mxu1 %vm2453_vm0, %v2452_v0  ;;  %1950 = vmatpush3.bf16.msra.mxu1 %v1149_v48  ;;  %v2127_v48 = vld [vmem:[%s3135_s17 + $0x8] sm:$0xff]  }
 0x542   : > { %1961 = vmatprep.subr.bf16.mxu1 %v2452_v0 }
 0x603   : > { %v1025_v16 = vpop.f32.mrb[12].mxu0 }
 0x604   : > { %v1935_v17 = vpop.f32.mrb[13].mxu0 }
 0x605   : > { %v1028_v18 = vpop.f32.mrb[14].mxu0 }
 0x606   : > { %v1936_v19 = vpop.f32.mrb[15].mxu0 }
 0x60b   : > { %v979_v20 = vpop.f32.mrb[8].mxu1 }
 0x60c   : > { %v2936_v21 = vadd.f32 %v1025_v16, %v979_v20  ;;  %v1929_v22 = vpop.f32.mrb[9].mxu1 }
 0x60d   : > { %v982_v24 = vpop.f32.mrb[10].mxu1  ;;  %v1829_v22 = vld [vmem:[#allocation8] ss:$0 sm:$0xff] }
 0x60e   : > { %v1930_v25 = vpop.f32.mrb[11].mxu1 }
 0x613   : > { %v1075_v26 = vpop.f32.mrb[12].mxu1 }
 0x614   : > { %v1081_v27 = vmul.f32 0.35355338, %v1075_v26  ;;  %v1941_v28 = vpop.f32.mrb[13].mxu1 }
 0x615   : > { %v1078_v29 = vpop.f32.mrb[14].mxu1 }
 0x616   : > { %v1942_v30 = vpop.f32.mrb[15].mxu1  ;;  %v1082_v31 = vadd.f32 %v1081_v27, %v2893_v23 }
 0x618   : > { %v1083_v32 = vsel %vm707_vm2, %v1082_v31, -inf }
 0x619   : > { %1084 = vmax.xlane.f32.xlu1 %v1083_v32 }
 0x62a   : > { %1194 = vrot.lane.b32.xlu1 %v2875_v10, %s2461_s25  ;;  %s2366_s25 = sshll.u32 %s2465_s14, 4  ;;  %s2367_s25 = int_to_ptr.vmem [resolvable:$false] %s2366_s25 }
 0x62e   : > { %1192 = vrot.lane.b32.xlu1 %v2875_v10, %s2462_s26  ;;  %s3136_s26 = sld [smem:[#allocation32_spill]] }
 0x6a6   : > { %v1085_v33 = vpop.xlane.xlu1 %1084 }
 0x6a7   : > { %v1086_v34 = vsub.f32 %v1082_v31, %v1085_v33 }
 0x6a9   : > { %v1087_v35 = vmul.f32 1.442695, %v1086_v34 }
 0x6aa   : > { %v1195_v43 = vpop.permute.xlu1 %1194 }
 0x6ab   : > { %2140 = vpow2.f32 %v1087_v35  ;;  %v1200_v45 = vsel %vm707_vm2, %v1195_v43, 0  ;;  %v1831_v43 = vld [vmem:[#allocation11] ss:$0 sm:$0xff] }
 0x6ae   : > { %v1193_v46 = vpop.permute.xlu1 %1192 }
 0x6b5   : > { %v2141_v36 = vpop.eup %2140 }
 0x6b6   : > { %v1089_v37 = vsel %vm707_vm2, %v2141_v36, 0.0 }
 0x6b7   : > { %1090 = vadd.xlane.f32.xlu0 %v1089_v37  ;;  %v2125_v37 = vld [vmem:[%s3134_s6 + $0x8] sm:$0xff]  }
 0x6cd   : > { %1095 = vrot.lane.b32.xlu0 %v2875_v10, %s2463_s18  ;;  %s3138_s18 = sld [smem:[#allocation33_spill]] }
 0x744   : > { %v1091_v38 = vpop.xlane.xlu0 %1090 }
 0x745   : > { %2142 = vrcp.f32 %v1091_v38 }
 0x748   : > { %v1096_v39 = vpop.permute.xlu0 %1095 }
 0x749   : > { %v1101_v40 = vsel %vm779_vm3, %v1096_v39, 0 }
 0x74a   : > { %1944 = vmatpush3.bf16.msra.mxu0 %v1101_v40 }
 0x74b   : > { %1955 = vmatprep.subr.bf16.mxu0 %v2452_v0 }
 0x74f   : > { %v2143_v41 = vpop.eup %2142 }
 0x750   : > { %v1093_v42 = vmul.f32 %v2143_v41, %v2141_v36  ;;  %v2124_v36 = vld [vmem:[%s3134_s6] sm:$0xff]   ;;  %v1830_v41 = vld [vmem:[#allocation10] ss:$0 sm:$0xff] }
 0x752   : > { %v1094_v44 = vpack.c.bf16 %v1093_v42, %v1093_v42 }
 0x754   : > { %1946 = vmatmul.mubr.msk.bf16.vlgmr.msra.gmra.mrb[16].mxu0 %vm707_vm2, %v1094_v44 }
 0x755   : > { %1956 = vmatpush3.bf16.xpose.msra.mxu0 %v1200_v45  ;;  %1957 = vmatprep.mubr.msk.bf16.mxu0 %vm2453_vm0, %v2452_v0 }
 0x756   : > { %1967 = vmatprep.subr.bf16.mxu0 %v2452_v0 }
 0x75c   : > { %1958 = vmatmul.mubr.msk.bf16.vlgmr.msra.gmra.mrb[20].mxu0 %vm707_vm2, %v1193_v46 }
 0x75d   : > { %1969 = vmatprep.mubr.msk.bf16.mxu0 %vm2453_vm0, %v2452_v0 }
 0x827   : > { %v1137_v49 = vpop.f32.mrb[16].mxu0 }
 0x828   : > { %v1143_v50 = vpack.c.bf16 %v1137_v49, %v1137_v49  ;;  %v1947_v51 = vpop.f32.mrb[17].mxu0  ;;  %v2128_v49 = vld [vmem:[%s3135_s17 + $0x10] sm:$0xff]  }
 0x829   : > { %v1140_v52 = vpop.f32.mrb[18].mxu0  ;;  %v1832_v51 = vld [vmem:[#allocation13] ss:$0 sm:$0xff] }
 0x82a   : > { %v1948_v53 = vpop.f32.mrb[19].mxu0  ;;  %1952 = vmatmul.mubr.msk.bf16.vlgmr.msra.gmra.mrb[16].mxu1 %vm707_vm2, %v1143_v50  ;;  %v2129_v50 = vld [vmem:[%s3135_s17 + $0x18] sm:$0xff]  }
 0x82b   : > { %1963 = vmatprep.mubr.msk.bf16.mxu1 %vm2453_vm0, %v2452_v0 }
 0x82f   : > { %v1236_v54 = vpop.f32.mrb[20].mxu0 }
 0x830   : > { %v1242_v55 = vmul.f32 0.35355338, %v1236_v54  ;;  %v1959_v56 = vpop.f32.mrb[21].mxu0 }
 0x831   : > { %v1239_v57 = vpop.f32.mrb[22].mxu0 }
 0x832   : > { %v1960_v58 = vpop.f32.mrb[23].mxu0  ;;  %v1243_v59 = vadd.f32 %v1242_v55, %v2893_v23  ;;  %v1305_v23 = vld [vmem:[%s3081_s5 + $0xc] sm:$0xf] }
 0x834   : > { %v1244_v60 = vsel %vm707_vm2, %v1243_v59, -inf }
 0x835   : > { %1245 = vmax.xlane.f32.xlu0 %v1244_v60 }
 0x84b   : > { %1256 = vrot.lane.b32.xlu0 %v2875_v10, %s2464_s28  ;;  %v1310_v10 = vsel %vm779_vm3, %v1305_v23, 0  ;;  %s1662_s28 = sshll.u32 %s625_s2, 4  ;;  %s3034_s28 = int_to_ptr.vmem [resolvable:$true] %s1662_s28 }
 0x84c   : > { %1968 = vmatpush3.bf16.msra.mxu0 %v1310_v10  ;;  %s2362_s24 = scalar_lea.vmem %s3034_s28, 16  ;;  %p2369_p6 = scmp.lt.s32.totalorder %s3034_s28, %s2367_s25 }
 0x84d   : > { %1981 = vmatprep.subr.bf16.mxu0 %v2452_v0  ;;  %p2363_p12 = scmp.ne.s32.totalorder %s3034_s28, %s2362_s24 }
 0x84f   : > { %p2364_p2 = pnand %p2363_p12, %p3140_p7 }
 0x851   : > { %p2365_p4 = pneg %p2364_p2 }
 0x8c2   : > { %v1246_v61 = vpop.xlane.xlu0 %1245 }
 0x8c3   : > { %v1247_v62 = vsub.f32 %v1243_v59, %v1246_v61 }
 0x8c5   : > { %v1248_v63 = vmul.f32 1.442695, %v1247_v62 }
 0x8c6   : > { %v1257_v1 = vpop.permute.xlu0 %1256 }
 0x8c7   : > { %2144 = vpow2.f32 %v1248_v63  ;;  %v1262_v2 = vsel %vm779_vm3, %v1257_v1, 0 }
 0x8c8   : > { %1962 = vmatpush3.bf16.msra.mxu1 %v1262_v2 }
 0x8c9   : > { %1973 = vmatprep.subr.bf16.mxu1 %v2452_v0 }
 0x8d1   : > { %v2145_v4 = vpop.eup %2144 }
 0x8d2   : > { %v1250_v5 = vsel %vm707_vm2, %v2145_v4, 0.0 }
 0x8d3   : > { %1251 = vadd.xlane.f32.xlu1 %v1250_v5  ;;  %v1836_v5 = vld [vmem:[#allocation14] ss:$0 sm:$0xff] }
 0x8fd   : > { %v1185_v6 = vpop.f32.mrb[16].mxu1 }
 0x8fe   : > { %v1191_v7 = vadd.f32 %v1185_v6, %v2936_v21  ;;  %v1953_v8 = vpop.f32.mrb[17].mxu1 }
 0x8ff   : > { %v1188_v9 = vpop.f32.mrb[18].mxu1 }
 0x900   : > { %v1954_v11 = vpop.f32.mrb[19].mxu1 }
 0x960   : > { %v1252_v12 = vpop.xlane.xlu1 %1251 }
 0x961   : > { %2146 = vrcp.f32 %v1252_v12 }
 0x96b   : > { %v2147_v13 = vpop.eup %2146 }
 0x96c   : > { %v1254_v14 = vmul.f32 %v2147_v13, %v2145_v4 }
 0x96e   : > { %v1255_v15 = vpack.c.bf16 %v1254_v14, %v1254_v14 }
 0x970   : > { %1964 = vmatmul.mubr.msk.bf16.vlgmr.msra.gmra.mrb[20].mxu1 %vm707_vm2, %v1255_v15 }
 0x971   : > { %1977 = vmatprep.mubr.msk.bf16.mxu1 %vm2453_vm0, %v2452_v0  ;;  %1974 = vmatpush3.bf16.msra.mxu1 %v2124_v36 }
 0x972   : > { %1975 = vmatprep.subr.bf16.mxu1 %v2452_v0 }
 0x975   : > { %1976 = vmatpush3.bf16.msra.mxu1 %v2125_v37 }
 0x976   : > { %1993 = vmatprep.subr.bf16.mxu1 %v2452_v0 }
 0xa43   : > { %v1298_v16 = vpop.f32.mrb[20].mxu1 }
 0xa44   : > { %v1304_v17 = vpack.c.bf16 %v1298_v16, %v1298_v16  ;;  %v1965_v18 = vpop.f32.mrb[21].mxu1 }
 0xa45   : > { %v1301_v19 = vpop.f32.mrb[22].mxu1  ;;  %v2131_v18 = vld [vmem:[%s3136_s26 + $0x8] sm:$0xff]  }
 0xa46   : > { %v1966_v20 = vpop.f32.mrb[23].mxu1  ;;  %1970 = vmatmul.mubr.msk.bf16.vlgmr.msra.gmra.mrb[24].mxu0 %vm707_vm2, %v1304_v17  ;;  %v2130_v17 = vld [vmem:[%s3136_s26] sm:$0xff]  }
 0xa47   : > { %1989 = vmatprep.mubr.msk.bf16.mxu0 %vm2453_vm0, %v2452_v0  ;;  %1982 = vmatpush3.bf16.msra.mxu0 %v2126_v47 }
 0xa48   : > { %1983 = vmatprep.subr.bf16.mxu0 %v2452_v0 }
 0xa4b   : > { %1984 = vmatpush3.bf16.msra.mxu0 %v2127_v48 }
 0xa4c   : > { %1985 = vmatprep.subr.bf16.mxu0 %v2452_v0 }
 0xa4f   : > { %1986 = vmatpush3.bf16.msra.mxu0 %v2128_v49 }
 0xa50   : > { %1987 = vmatprep.subr.bf16.mxu0 %v2452_v0 }
 0xa53   : > { %1988 = vmatpush3.bf16.msra.mxu0 %v2129_v50 }
 0xb19   : > { %v1346_v21 = vpop.f32.mrb[24].mxu0 }
 0xb1a   : > { %v1352_v24 = vadd.f32 %v1346_v21, %v1191_v7  ;;  %v1971_v25 = vpop.f32.mrb[25].mxu0 }
 0xb1b   : > { %v1349_v26 = vpop.f32.mrb[26].mxu0 }
 0xb1c   : > { %v1360_v27 = vadd.f32 %v1829_v22, %v1352_v24  ;;  %v1972_v28 = vpop.f32.mrb[27].mxu0  ;;  %v1842_v24 = vld [vmem:[#allocation16] ss:$0 sm:$0xff]  ;;  %v1843_v26 = vld [vmem:[%s3137_s23] ss:$0 sm:$0xff] }
 0xb1e   : > { %v1361_v29 = vadd.f32 %v1360_v27, %v2863_v3 }
 0xb20   : > { %v1364_v30 = vsel %vm659_vm1, %v1361_v29, 0.0 }
 0xb21   : > { %1365 = vadd.xlane.f32.xlu1 %v1364_v30  ;;  %v1592_v30 = vld [vmem:[%s3138_s18] sm:$0x1]  ;;  %s2368_s18 = scalar_lea.vmem %s2367_s25, 32 }
 0xb22   : > { %p2370_p5 = scmp.lt.s32.totalorder %s2368_s18, %s2362_s24 }
 0xb24   : > { %p2371_p3 = por %p2370_p5, %p2369_p6 }
 0xb26   : > { %p2372_p13 = pnand %p2371_p3, %p2365_p4 }
 0xbae   : > { %v1366_v31 = vpop.xlane.xlu1 %1365 }
 0xbaf   : > { %v1368_v32 = vmul.f32 0.03125, %v1366_v31 }
 0xbb1   : > { %v1369_v33 = vsub.f32 %v1361_v29, %v1368_v32 }
 0xbb3   : > { %v1370_v34 = vmul.f32 %v1369_v33, %v1369_v33 }
 0xbb5   : > { %v1371_v35 = vsel %vm659_vm1, %v1370_v34, 0.0 }
 0xbb6   : > { %1372 = vadd.xlane.f32.xlu1 %v1371_v35 }
 0xc43   : > { %v1373_v3 = vpop.xlane.xlu1 %1372 }
 0xc44   : > { %v1374_v38 = vmul.f32 0.03125, %v1373_v3 }
 0xc46   : > { %v1375_v39 = vadd.f32 1e-05, %v1374_v38 }
 0xc48   : > { %2148 = vrsqrt.f32 %v1375_v39 }
 0xc52   : > { %v2149_v40 = vpop.eup %2148 }
 0xc53   : > { %v1377_v42 = vmul.f32 %v2149_v40, %v1369_v33 }
 0xc55   : > { %v1384_v44 = vmul.f32 %v1830_v41, %v1377_v42 }
 0xc57   : > { %v1391_v45 = vadd.f32 %v1831_v43, %v1384_v44 }
 0xc59   : > { %v1392_v46 = vpack.c.bf16 %v1391_v45, %v1391_v45 }
 0xc5b   : > { %1978 = vmatmul.mubr.msk.bf16.vlgmr.msra.gmra.mrb[24].mxu1 %vm659_vm1, %v1392_v46 }
 0xc5c   : > { %1997 = vmatprep.mubr.msk.bf16.mxu1 %vm2453_vm0, %v2452_v0  ;;  %1994 = vmatpush3.bf16.msra.mxu1 %v2130_v17 }
 0xc5d   : > { %1995 = vmatprep.subr.bf16.mxu1 %v2452_v0 }
 0xc60   : > { %1996 = vmatpush3.bf16.msra.mxu1 %v2131_v18 }
 0xd2e   : > { %v1453_v52 = vpop.f32.mrb[24].mxu1 }
 0xd2f   : > { %v1454_v53 = vadd.f32 %v1832_v51, %v1453_v52  ;;  %v1979_v54 = vpop.f32.mrb[25].mxu1 }
 0xd30   : > { %v1456_v55 = vpop.f32.mrb[26].mxu1 }
 0xd31   : > { %v1460_v56 = vmul.f32 0.044715, %v1454_v53  ;;  %v1980_v57 = vpop.f32.mrb[27].mxu1  ;;  %v1459_v63 = vmul.f32 0.5, %v1454_v53 }
 0xd33   : > { %v1461_v58 = vmul.f32 %v1460_v56, %v1454_v53 }
 0xd35   : > { %v1462_v59 = vmul.f32 %v1461_v58, %v1454_v53 }
 0xd37   : > { %v1463_v60 = vadd.f32 %v1462_v59, %v1454_v53 }
 0xd39   : > { %v1464_v61 = vmul.f32 0.7978846, %v1463_v60 }
 0xd3b   : > { %2150 = vtanh.f32 %v1464_v61 }
 0xd45   : > { %v2151_v62 = vpop.eup %2150 }
 0xd46   : > { %v1466_v1 = vadd.f32 1.0, %v2151_v62 }
 0xd48   : > { %v1467_v2 = vmul.f32 %v1466_v1, %v1459_v63 }
 0xd4a   : > { %v1468_v4 = vpack.c.bf16 %v1467_v2, %v1467_v2 }
 0xd4c   : > { %1990 = vmatmul.mubr.msk.bf16.vlgmr.msra.gmra.mrb[28].mxu0 %vm1508_vm4, %v1468_v4 }
 0xe1f   : > { %v1546_v23 = vpop.f32.mrb[28].mxu0 }
 0xe20   : > { %v1547_v10 = vadd.f32 %v1836_v5, %v1546_v23  ;;  %v1991_v6 = vpop.f32.mrb[29].mxu0 }
 0xe21   : > { %v1549_v7 = vpop.f32.mrb[30].mxu0 }
 0xe22   : > { %v1992_v8 = vpop.f32.mrb[31].mxu0  ;;  %v1552_v9 = vadd.f32 %v1547_v10, %v1391_v45 }
 0xe24   : > { %v1555_v11 = vsel %vm659_vm1, %v1552_v9, 0.0 }
 0xe25   : > { %1556 = vadd.xlane.f32.xlu1 %v1555_v11 }
 0xeb2   : > { %v1557_v12 = vpop.xlane.xlu1 %1556 }
 0xeb3   : > { %v1558_v13 = vmul.f32 0.03125, %v1557_v12 }
 0xeb5   : > { %v1559_v14 = vsub.f32 %v1552_v9, %v1558_v13 }
 0xeb7   : > { %v1560_v15 = vmul.f32 %v1559_v14, %v1559_v14 }
 0xeb9   : > { %v1561_v16 = vsel %vm659_vm1, %v1560_v15, 0.0 }
 0xeba   : > { %1562 = vadd.xlane.f32.xlu1 %v1561_v16 }
 0xf47   : > { %v1563_v19 = vpop.xlane.xlu1 %1562 }
 0xf48   : > { %v1564_v20 = vmul.f32 0.03125, %v1563_v19 }
 0xf4a   : > { %v1565_v21 = vadd.f32 1e-05, %v1564_v20 }
 0xf4c   : > { %2152 = vrsqrt.f32 %v1565_v21 }
 0xf56   : > { %v2153_v22 = vpop.eup %2152 }
 0xf57   : > { %v1567_v25 = vmul.f32 %v2153_v22, %v1559_v14 }
 0xf59   : > { %v1574_v27 = vmul.f32 %v1842_v24, %v1567_v25 }
 0xf5b   : > { %v1581_v28 = vadd.f32 %v1843_v26, %v1574_v27 }
 0xf5d   : > { %1582 = vst.msk [vmem:[#allocation2] sm:$0xff] %vm659_vm1, %v1581_v28 }
 0xf64   : > { %v1854_v0 = vld [vmem:[%s1852_s15 - $0x2] sm:$0x1]  ;;  %s1650_s15 = scalar_lea.sflag [#allocation7], %s2826_s22 }
 0xf65   : > { %v1587_v29 = vpack.c.bf16 %v1854_v0, %v1854_v0 }
 0xf67   : > { %1998 = vmatmul.mubr.msk.bf16.vlgmr.msra.gmra.mrb[28].mxu1 %vm659_vm1, %v1587_v29 }
0x103a   : > { %v1642_v31 = vpop.f32.mrb[28].mxu1 }
0x103b   : > { %v1643_v32 = vadd.f32 %v1642_v31, %v1592_v30  ;;  %v1999_v33 = vpop.f32.mrb[29].mxu1 }
0x103c   : > { %v1645_v34 = vpop.f32.mrb[30].mxu1 }
0x103d   : > { %1648 = vst [vmem:[%s625_s2] sm:$0x1] %v1643_v32  ;;  %v2000_v35 = vpop.f32.mrb[31].mxu1 }
0x103e   : > { %2375 = shalt.err (!%p2372_p13)
}
0x103f   : > { %s2376_s2 = scalar_lea.hbm %s3032_s29, 16  ;;  %s2380_s30 = scalar_lea.hbm %s3139_s3, 32 }
0x1040   : > { %p2377_p0 = scmp.ne.s32.totalorder %s3032_s29, %s2376_s2  ;;  %p2381_p8 = scmp.lt.u32.totalorder %s3032_s29, %s3139_s3 }
0x1041   : > { %p2382_p10 = scmp.lt.u32.totalorder %s2380_s30, %s2376_s2  ;;  %p2384_p12 = scmp.lt.u32.totalorder %s2376_s2, %s3032_s29 }
0x1042   : > { %p2378_p1 = pnand %p2377_p0, %p3140_p7 }
0x1043   : > { %p2383_p9 = por %p2382_p10, %p2381_p8 }
0x1044   : > { %p2379_p11 = pneg %p2378_p1 }
0x1045   : > { %p2385_p2 = por %p2384_p12, %p2383_p9 }
0x1047   : > { %p2386_p4 = pnand %p2385_p2, %p2379_p11 }
0x1049   : > { %2389 = shalt.err (!%p2386_p4)
}
0x104a   : > { %2027 = dma.vmem_to_hbm [thread:$0]  (%p3140_p7), %s3034_s28, 16, %s3032_s29, %s1650_s15  }
0x104b PF: > { %s1674_s24 = sand.u32 1, %s2430_s1   ;;  %p3141_p6 = scmp.ne.s32.totalorder %s3122_s9, 0 }
0x104c   : > { %p3142_p5 = scmp.ge.s32.totalorder %s2442_s21, 2  ;;  %s1675_s25 = scalar_lea.sflag [#allocation7], %s1674_s24 }
0x104e   : > { %p2053_p3 = pnand %p3142_p5, %p3141_p6 }
0x1050   : > { %2425 = dma.done.wait (!%p2053_p3), %s1675_s25, 16  }
0x1051   : > { %2427 = vsyncadd (!%p2053_p3), %s1675_s25, 4294967280  ;;  %p37_p13 = scmp.ge.s32.totalorder %s2750_s0, 4   ;;  %s3143_s1 = smov %s2434_s11 }
0x1052   : > { %s3144_s11 = smov %s2438_s20  ;;  %s3145_s20 = smov %s2761_s16 }
0x1053   : > { %s3146_s21 = smov %s2750_s0  ;;  %39 = sbr.rel (!%p37_p13) target bundleno = 28 (0x1c), region = 157 }
0x105a   :  { %1679 = vsyncpa [#allocation6], 1 }
0x105b   :  { %1681 = vsyncpa [#allocation6 + $0x1], 1 }
0x105c   :  { %1682 = vsyncpa [#allocation9], 1 }
0x105d   :  { %1683 = vsyncpa [#allocation12], 1 }
0x105e   :  { %1684 = vsyncpa [#allocation15], 1 }
0x105f   :  { %1685 = vsyncpa [#allocation7], 1 }
0x1060   :  { %1687 = vsyncpa [#allocation7 + $0x1], 1 }

</bundles_post_ra>
